<compile_context>
chip_gen: v5e
topology: v5e:2x2
jax: 0.10.0
libtpu: 0.0.40
codegen_flags: <defaults>
</compile_context>

<pallas_src>
import functools

import jax
import jax.numpy as jnp
import numpy as np
from jax import lax
from jax.experimental import pallas as pl
from jax.experimental.pallas import tpu as pltpu

BN_EPS = 1e-5


# ----------------------------- Pallas kernels ------------------------------ #

def _resblock_kernel(x_ref, pb1_ref, w1_ref, pb23_ref, w2_ref, w3_ref,
                     out_ref, pad_ref, *, H, W):
    """Fused pre-activated bottleneck ResBlock (in==out channels, stride 1).

    x_ref:   (1, C, H*W) f32     input image (channels in sublanes, spatial in lanes)
    pb1_ref: (C, 2)      f32     bn1 [scale, bias]
    w1_ref:  (cmid, C)   bf16    1x1 conv #1, bn2 scale folded into rows
    pb23_ref:(cmid, 2)   f32     [bn2 bias, bn3 bias]
    w2_ref:  (cmid, 9*cmid) bf16 3x3 conv as (O, kh*kw*I), bn3 scale folded
    w3_ref:  (C, cmid)   bf16    1x1 conv #2
    out_ref: (1, C, H*W) f32     x + bottleneck(x)
    pad_ref: (cmid, H*W + 2*(W+1)) f32 scratch: zero-padded flattened spatial
    """
    HW = H * W
    x = x_ref[0]                                                   # (C, HW)

    # bn1 + relu  (pre-activation; identity path uses raw x: in==out, stride 1)
    a1 = jnp.maximum(x * pb1_ref[:, 0:1] + pb1_ref[:, 1:2], 0.0)

    # 1x1 conv (bn2 scale pre-folded) + bn2 bias + relu
    y1 = jnp.dot(w1_ref[...], a1.astype(jnp.bfloat16),
                 preferred_element_type=jnp.float32)               # (cmid, HW)
    a2 = jnp.maximum(y1 + pb23_ref[:, 0:1], 0.0)

    # 3x3 conv, stride 1, pad 1 -- all 9 taps taken from a zero-padded
    # flattened-spatial VMEM scratch, consumed by ONE wide-K matmul.
    pad_ref[...] = jnp.zeros_like(pad_ref)
    pad_ref[:, pl.ds(W + 1, HW)] = a2

    wpos = lax.broadcasted_iota(jnp.int32, (1, HW), 1) % W
    not_left = (wpos >= 1).astype(jnp.float32)        # valid when dw == -1
    not_right = (wpos <= W - 2).astype(jnp.float32)   # valid when dw == +1

    taps = []
    for dh in (-1, 0, 1):
        for dw in (-1, 0, 1):
            t = pad_ref[:, pl.ds(W + 1 + dh * W + dw, HW)]         # (cmid, HW)
            if dw == -1:
                t = t * not_left
            elif dw == 1:
                t = t * not_right
            taps.append(t)
    patches = jnp.concatenate(taps, axis=0)                        # (9*cmid, HW)

    y2 = jnp.dot(w2_ref[...], patches.astype(jnp.bfloat16),
                 preferred_element_type=jnp.float32)               # (cmid, HW)
    a3 = jnp.maximum(y2 + pb23_ref[:, 1:2], 0.0)

    # final 1x1 conv + residual add
    y3 = jnp.dot(w3_ref[...], a3.astype(jnp.bfloat16),
                 preferred_element_type=jnp.float32)               # (C, HW)
    out_ref[0] = x + y3


def _mask_gate_kernel(s_ref, t_ref, m_ref, pb4_ref, w4_ref, b5_ref, w5_ref,
                      out_ref):
    """Fused: bilinear upsample (matmul) + trunk add + two pre-activated 1x1
    conv blocks + sigmoid + (1 + mask) * trunk gating."""
    trunk = t_ref[0]                                               # (C, HW)
    up = jnp.dot(s_ref[0], m_ref[...],
                 preferred_element_type=jnp.float32)               # (C, HW)
    z = up + trunk                                                 # out_interp1

    a = jnp.maximum(z * pb4_ref[:, 0:1] + pb4_ref[:, 1:2], 0.0)    # bn4+relu
    u = jnp.dot(w4_ref[...], a.astype(jnp.bfloat16),
                preferred_element_type=jnp.float32)                # conv4 (bn5 scale folded)
    b = jnp.maximum(u + b5_ref[...], 0.0)                          # bn5 bias + relu
    v = jnp.dot(w5_ref[...], b.astype(jnp.bfloat16),
                preferred_element_type=jnp.float32)                # conv5
    g = 1.0 / (1.0 + jnp.exp(-v))                                  # sigmoid
    out_ref[0] = (1.0 + g) * trunk


# ----------------------------- kernel wrappers ------------------------------ #

def _resblock_call(x_flat, p, H, W):
    N, C, HW = x_flat.shape
    cmid = p["w1"].shape[0]
    kern = functools.partial(_resblock_kernel, H=H, W=W)
    flops = 2 * N * HW * (C * cmid + 9 * cmid * cmid + cmid * C)
    bytes_accessed = (4 * N * C * HW * 2
                      + 2 * (cmid * C + 9 * cmid * cmid + C * cmid))
    return pl.pallas_call(
        kern,
        out_shape=jax.ShapeDtypeStruct((N, C, HW), jnp.float32),
        grid_spec=pltpu.PrefetchScalarGridSpec(
            num_scalar_prefetch=0,
            grid=(N,),
            in_specs=[
                pl.BlockSpec((1, C, HW), lambda n: (n, 0, 0)),
                pl.BlockSpec((C, 2), lambda n: (0, 0)),
                pl.BlockSpec((cmid, C), lambda n: (0, 0)),
                pl.BlockSpec((cmid, 2), lambda n: (0, 0)),
                pl.BlockSpec((cmid, 9 * cmid), lambda n: (0, 0)),
                pl.BlockSpec((C, cmid), lambda n: (0, 0)),
            ],
            out_specs=pl.BlockSpec((1, C, HW), lambda n: (n, 0, 0)),
            scratch_shapes=[pltpu.VMEM((cmid, HW + 2 * (W + 1)), jnp.float32)],
        ),
        compiler_params=pltpu.CompilerParams(
            dimension_semantics=("parallel",),
            vmem_limit_bytes=32 * 1024 * 1024,
        ),
        cost_estimate=pl.CostEstimate(flops=int(flops), transcendentals=0,
                                      bytes_accessed=int(bytes_accessed)),
    )(x_flat, p["pb1"], p["w1"], p["pb23"], p["w2"], p["w3"])


def _mask_gate_call(s_flat, trunk_flat, m_mat, p):
    N, C, HWs = s_flat.shape
    HW = trunk_flat.shape[2]
    flops = 2 * N * (C * HWs * HW + 2 * C * C * HW)
    bytes_accessed = 4 * N * C * (HWs + 2 * HW) + 4 * HWs * HW + 2 * 2 * C * C
    return pl.pallas_call(
        _mask_gate_kernel,
        out_shape=jax.ShapeDtypeStruct((N, C, HW), jnp.float32),
        grid_spec=pltpu.PrefetchScalarGridSpec(
            num_scalar_prefetch=0,
            grid=(N,),
            in_specs=[
                pl.BlockSpec((1, C, HWs), lambda n: (n, 0, 0)),
                pl.BlockSpec((1, C, HW), lambda n: (n, 0, 0)),
                pl.BlockSpec((HWs, HW), lambda n: (0, 0)),
                pl.BlockSpec((C, 2), lambda n: (0, 0)),
                pl.BlockSpec((C, C), lambda n: (0, 0)),
                pl.BlockSpec((C, 1), lambda n: (0, 0)),
                pl.BlockSpec((C, C), lambda n: (0, 0)),
            ],
            out_specs=pl.BlockSpec((1, C, HW), lambda n: (n, 0, 0)),
        ),
        compiler_params=pltpu.CompilerParams(
            dimension_semantics=("parallel",),
            vmem_limit_bytes=32 * 1024 * 1024,
        ),
        cost_estimate=pl.CostEstimate(flops=int(flops),
                                      transcendentals=int(N * C * HW),
                                      bytes_accessed=int(bytes_accessed)),
    )(s_flat, trunk_flat, m_mat, p["pb4"], p["w4"], p["b5"], p["w5"])


# ------------------------------- JAX glue ---------------------------------- #

def _fold_bn(bn):
    gamma, beta, mean, var = bn
    s = gamma / jnp.sqrt(var + BN_EPS)
    return s, beta - mean * s


def prepare_kernel_params(params):
    """Fold BN scales into conv weights, pack scale/bias, cast weights to bf16."""

    def prep_block(p):
        cmid = p["w1"].shape[0]
        s1, t1 = _fold_bn(p["bn1"])
        s2, t2 = _fold_bn(p["bn2"])
        s3, t3 = _fold_bn(p["bn3"])
        w2m = jnp.transpose(p["w2"], (0, 2, 3, 1)).reshape(cmid, 9 * cmid)
        return dict(
            pb1=jnp.stack([s1, t1], axis=1).astype(jnp.float32),
            w1=(s2[:, None] * p["w1"][:, :, 0, 0]).astype(jnp.bfloat16),
            pb23=jnp.stack([t2, t3], axis=1).astype(jnp.float32),
            w2=(s3[:, None] * w2m).astype(jnp.bfloat16),
            w3=p["w3"][:, :, 0, 0].astype(jnp.bfloat16),
        )

    g = params["gate"]
    s4, t4 = _fold_bn(g["bn4"])
    s5, t5 = _fold_bn(g["bn5"])
    gate = dict(
        pb4=jnp.stack([s4, t4], axis=1).astype(jnp.float32),
        w4=(s5[:, None] * g["w4"][:, :, 0, 0]).astype(jnp.bfloat16),
        b5=t5[:, None].astype(jnp.float32),
        w5=g["w5"][:, :, 0, 0].astype(jnp.bfloat16),
    )
    out = {k: prep_block(params[k]) for k in
           ("first", "trunk1", "trunk2", "soft1", "soft2", "last")}
    out["gate"] = gate
    return out


def attention_module_stage3_forward(x_nchw, kp, interp_mat):
    n, c, h, w = x_nchw.shape
    x = x_nchw.reshape(n, c, h * w).astype(jnp.float32)

    h1 = _resblock_call(x, kp["first"], h, w)
    trunk = _resblock_call(_resblock_call(h1, kp["trunk1"], h, w),
                           kp["trunk2"], h, w)

    # TODO(synk): 3x3/stride-2 max-pool stays as an XLA reduce_window (tiny op).
    mp4 = lax.reduce_window(h1.reshape(n, c, h, w), -jnp.inf, lax.max,
                            (1, 1, 3, 3), (1, 1, 2, 2),
                            ((0, 0), (0, 0), (1, 1), (1, 1)))
    hp, wp = mp4.shape[2], mp4.shape[3]
    mp = mp4.reshape(n, c, hp * wp)

    sm = _resblock_call(_resblock_call(mp, kp["soft1"], hp, wp),
                        kp["soft2"], hp, wp)
    gated = _mask_gate_call(sm, trunk, interp_mat, kp["gate"])
    y = _resblock_call(gated, kp["last"], h, w)
    return y.reshape(n, c, h, w)


def bilinear_matrix_align_corners(dst, src):
    a = np.zeros((dst, src), np.float64)
    if dst == 1 or src == 1:
        a[:, 0] = 1.0
        return a.astype(np.float32)
    scale = (src - 1) / (dst - 1)
    for i in range(dst):
        s = i * scale
        i0 = min(int(np.floor(s)), src - 1)
        frac = s - i0
        if i0 + 1 <= src - 1:
            a[i, i0] = 1.0 - frac
            a[i, i0 + 1] = frac
        else:
            a[i, i0] = 1.0
    return a.astype(np.float32)


# -------------------------- params / reference ------------------------------ #

def init_params(key, channels):
    cmid = channels // 4

    def bn_init(k, c):
        k1, k2, k3, k4 = jax.random.split(k, 4)
        gamma = 1.0 + 0.1 * jax.random.normal(k1, (c,), jnp.float32)
        beta = 0.1 * jax.random.normal(k2, (c,), jnp.float32)
        mean = 0.1 * jax.random.normal(k3, (c,), jnp.float32)
        var = jnp.abs(jax.random.normal(k4, (c,), jnp.float32)) + 0.5
        return (gamma, beta, mean, var)

    def conv_init(k, o, i, kh, kw):
        return 0.1 * jax.random.normal(k, (o, i, kh, kw), jnp.float32)

    def bottleneck_init(k):
        ks = jax.random.split(k, 6)
        return dict(
            bn1=bn_init(ks[0], channels),
            w1=conv_init(ks[1], cmid, channels, 1, 1),
            bn2=bn_init(ks[2], cmid),
            w2=conv_init(ks[3], cmid, cmid, 3, 3),
            bn3=bn_init(ks[4], cmid),
            w3=conv_init(ks[5], channels, cmid, 1, 1),
        )

    ks = jax.random.split(key, 7)
    kg = jax.random.split(ks[6], 4)
    gate = dict(
        bn4=bn_init(kg[0], channels),
        w4=conv_init(kg[1], channels, channels, 1, 1),
        bn5=bn_init(kg[2], channels),
        w5=conv_init(kg[3], channels, channels, 1, 1),
    )
    return dict(first=bottleneck_init(ks[0]), trunk1=bottleneck_init(ks[1]),
                trunk2=bottleneck_init(ks[2]), soft1=bottleneck_init(ks[3]),
                soft2=bottleneck_init(ks[4]), last=bottleneck_init(ks[5]),
                gate=gate)


def _ref_bn_relu(x, bn):
    gamma, beta, mean, var = bn
    s = (gamma / jnp.sqrt(var + BN_EPS))[None, :, None, None]
    y = (x - mean[None, :, None, None]) * s + beta[None, :, None, None]
    return jnp.maximum(y, 0.0)


def _ref_conv(x, w, stride=1, padding=0):
    return lax.conv_general_dilated(
        x, w, (stride, stride), ((padding, padding), (padding, padding)),
        dimension_numbers=("NCHW", "OIHW", "NCHW"),
        precision=lax.Precision.HIGHEST)


def _ref_resblock(x, p):
    a1 = _ref_bn_relu(x, p["bn1"])
    y1 = _ref_conv(a1, p["w1"])
    a2 = _ref_bn_relu(y1, p["bn2"])
    y2 = _ref_conv(a2, p["w2"], 1, 1)
    a3 = _ref_bn_relu(y2, p["bn3"])
    y3 = _ref_conv(a3, p["w3"])
    return x + y3


def ref_attention_module_stage3(x, params, a_h, a_w):
    h1 = _ref_resblock(x, params["first"])
    trunk = _ref_resblock(_ref_resblock(h1, params["trunk1"]), params["trunk2"])
    mp = lax.reduce_window(h1, -jnp.inf, lax.max, (1, 1, 3, 3), (1, 1, 2, 2),
                           ((0, 0), (0, 0), (1, 1), (1, 1)))
    sm = _ref_resblock(_ref_resblock(mp, params["soft1"]), params["soft2"])
    up = jnp.einsum("ik,jl,nckl->ncij", a_h, a_w, sm,
                    precision=lax.Precision.HIGHEST)
    z = up + trunk
    g = params["gate"]
    a = _ref_bn_relu(z, g["bn4"])
    u = _ref_conv(a, g["w4"])
    b = _ref_bn_relu(u, g["bn5"])
    v = _ref_conv(b, g["w5"])
    mask = jax.nn.sigmoid(v)
    out = (1.0 + mask) * trunk
    return _ref_resblock(out, params["last"])


# ---------------------------------- main ------------------------------------ #

if __name__ == "__main__":
    key = jax.random.PRNGKey(0)
    k_x, k_p = jax.random.split(key)

    # AttentionModule_stage3 default size1=(14,14); in_channels == out_channels.
    N, C, H, W = 2, 32, 14, 14
    x = jax.random.normal(k_x, (N, C, H, W), jnp.float32)
    params = init_params(k_p, C)
    kparams = prepare_kernel_params(params)

    hp = (H + 2 - 3) // 2 + 1
    wp = (W + 2 - 3) // 2 + 1
    a_h = bilinear_matrix_align_corners(H, hp)
    a_w = bilinear_matrix_align_corners(W, wp)
    interp_mat = jnp.asarray(np.kron(a_h, a_w).T)  # (hp*wp, H*W)

    fwd = jax.jit(attention_module_stage3_forward)
    y = jax.block_until_ready(fwd(x, kparams, interp_mat))

    y_ref = ref_attention_module_stage3(x, params, jnp.asarray(a_h),
                                        jnp.asarray(a_w))
    assert y.shape == (N, C, H, W), y.shape
    # tolerance reflects bf16 MXU operands in the Pallas path vs f32 reference
    np.testing.assert_allclose(np.asarray(y), np.asarray(y_ref),
                               rtol=3e-2, atol=3e-2)
    print("KERNEL_OK")
</pallas_src>

<mosaic_0001>
module attributes {stable_mosaic.version = 11 : i64} {
  func.func @_resblock_kernel(%arg0: i32, %arg1: memref<1x32x196xf32, #tpu.memory_space<vmem>>, %arg2: memref<32x2xf32, #tpu.memory_space<vmem>>, %arg3: memref<8x32xbf16, #tpu.memory_space<vmem>>, %arg4: memref<8x2xf32, #tpu.memory_space<vmem>>, %arg5: memref<8x72xbf16, #tpu.memory_space<vmem>>, %arg6: memref<32x8xbf16, #tpu.memory_space<vmem>>, %arg7: memref<1x32x196xf32, #tpu.memory_space<vmem>>, %arg8: memref<8x226xf32, #tpu.memory_space<vmem>>) attributes {dimension_semantics = [#tpu.dimension_semantics<parallel>], iteration_bounds = array<i64: 2>, scalar_prefetch = 0 : i64, scratch_operands = 1 : i64, tpu.core_type = #tpu.core_type<tc>, window_params = [{transform_indices = @transform_0, window_bounds = array<i64: 1, 32, 196>}, {pipeline_mode = #tpu.pipeline_mode<synchronous>, transform_indices = @transform_1, window_bounds = array<i64: 32, 2>}, {pipeline_mode = #tpu.pipeline_mode<synchronous>, transform_indices = @transform_2, window_bounds = array<i64: 8, 32>}, {pipeline_mode = #tpu.pipeline_mode<synchronous>, transform_indices = @transform_3, window_bounds = array<i64: 8, 2>}, {pipeline_mode = #tpu.pipeline_mode<synchronous>, transform_indices = @transform_4, window_bounds = array<i64: 8, 72>}, {pipeline_mode = #tpu.pipeline_mode<synchronous>, transform_indices = @transform_5, window_bounds = array<i64: 32, 8>}, {transform_indices = @transform_6, window_bounds = array<i64: 1, 32, 196>}]} {
    %c0 = arith.constant 0 : index
    %c0_0 = arith.constant 0 : index
    %c0_1 = arith.constant 0 : index
    %0 = vector.load %arg1[%c0, %c0_0, %c0_1] : memref<1x32x196xf32, #tpu.memory_space<vmem>>, vector<1x32x196xf32>
    %1 = vector.shape_cast %0 : vector<1x32x196xf32> to vector<32x196xf32>
    %c0_2 = arith.constant 0 : index
    %c0_3 = arith.constant 0 : index
    %2 = vector.load %arg2[%c0_2, %c0_3] : memref<32x2xf32, #tpu.memory_space<vmem>>, vector<32x1xf32>
    %3 = vector.broadcast %2 : vector<32x1xf32> to vector<32x196xf32>
    %4 = arith.mulf %1, %3 : vector<32x196xf32>
    %c0_4 = arith.constant 0 : index
    %c1 = arith.constant 1 : index
    %5 = vector.load %arg2[%c0_4, %c1] : memref<32x2xf32, #tpu.memory_space<vmem>>, vector<32x1xf32>
    %6 = vector.broadcast %5 : vector<32x1xf32> to vector<32x196xf32>
    %7 = arith.addf %4, %6 : vector<32x196xf32>
    %cst = arith.constant 0.000000e+00 : f32
    %8 = vector.broadcast %cst : f32 to vector<32x196xf32>
    %9 = arith.maximumf %7, %8 : vector<32x196xf32>
    %c0_5 = arith.constant 0 : index
    %c0_6 = arith.constant 0 : index
    %10 = vector.load %arg3[%c0_5, %c0_6] : memref<8x32xbf16, #tpu.memory_space<vmem>>, vector<8x32xbf16>
    %11 = arith.truncf %9 : vector<32x196xf32> to vector<32x196xbf16>
    %cst_7 = arith.constant dense<0.000000e+00> : vector<8x196xf32>
    %12 = tpu.matmul %10, %11, %cst_7 {dimension_numbers = #tpu.dot_dimension_numbers<[1], [0], [0], [1], [0, 0, 1, 1], [], []>} : vector<8x32xbf16>, vector<32x196xbf16>, vector<8x196xf32> -> vector<8x196xf32>
    %c0_8 = arith.constant 0 : index
    %c0_9 = arith.constant 0 : index
    %13 = vector.load %arg4[%c0_8, %c0_9] : memref<8x2xf32, #tpu.memory_space<vmem>>, vector<8x1xf32>
    %14 = vector.broadcast %13 : vector<8x1xf32> to vector<8x196xf32>
    %15 = arith.addf %12, %14 : vector<8x196xf32>
    %cst_10 = arith.constant 0.000000e+00 : f32
    %16 = vector.broadcast %cst_10 : f32 to vector<8x196xf32>
    %17 = arith.maximumf %15, %16 : vector<8x196xf32>
    %cst_11 = arith.constant 0.000000e+00 : f32
    %18 = vector.broadcast %cst_11 : f32 to vector<8x226xf32>
    %c0_12 = arith.constant 0 : index
    %c0_13 = arith.constant 0 : index
    %19 = vector.load %arg8[%c0_12, %c0_13] : memref<8x226xf32, #tpu.memory_space<vmem>>, vector<8x226xf32>
    tpu.vector_store %arg8[%c0_12, %c0_13], %18 {strides = array<i32>} : memref<8x226xf32, #tpu.memory_space<vmem>>, vector<8x226xf32>,
    %c0_14 = arith.constant 0 : index
    %c15 = arith.constant 15 : index
    %20 = vector.load %arg8[%c0_14, %c15] : memref<8x226xf32, #tpu.memory_space<vmem>>, vector<8x196xf32>
    tpu.vector_store %arg8[%c0_14, %c15], %17 {strides = array<i32>} : memref<8x226xf32, #tpu.memory_space<vmem>>, vector<8x196xf32>,
    %21 = tpu.iota {dimensions = array<i32: 1>} : vector<1x196xi32>
    %c14_i32 = arith.constant 14 : i32
    %c0_i32 = arith.constant 0 : i32
    %22 = arith.cmpi eq, %c14_i32, %c0_i32 : i32
    %c1_i32 = arith.constant 1 : i32
    %23 = arith.select %22, %c1_i32, %c14_i32 : i32
    %24 = vector.broadcast %23 : i32 to vector<1x196xi32>
    %25 = arith.remsi %21, %24 : vector<1x196xi32>
    %c0_i32_15 = arith.constant 0 : i32
    %26 = vector.broadcast %c0_i32_15 : i32 to vector<1x196xi32>
    %27 = arith.cmpi ne, %25, %26 : vector<1x196xi32>
    %c0_i32_16 = arith.constant 0 : i32
    %28 = vector.broadcast %c0_i32_16 : i32 to vector<1x196xi32>
    %29 = arith.cmpi slt, %25, %28 : vector<1x196xi32>
    %c0_i32_17 = arith.constant 0 : i32
    %30 = arith.cmpi slt, %23, %c0_i32_17 : i32
    %31 = vector.broadcast %30 : i1 to vector<1x196xi1>
    %32 = vector.broadcast %31 : vector<1x196xi1> to vector<1x196xi1>
    %33 = arith.xori %29, %32 : vector<1x196xi1>
    %34 = arith.andi %33, %27 : vector<1x196xi1>
    %35 = vector.broadcast %23 : i32 to vector<1x196xi32>
    %36 = arith.addi %25, %35 : vector<1x196xi32>
    %37 = arith.select %34, %36, %25 : vector<1x196xi1>, vector<1x196xi32>
    %c1_i32_18 = arith.constant 1 : i32
    %38 = vector.broadcast %c1_i32_18 : i32 to vector<1x196xi32>
    %39 = arith.cmpi sge, %37, %38 : vector<1x196xi32>
    %40 = arith.extui %39 : vector<1x196xi1> to vector<1x196xi32>
    %41 = arith.sitofp %40 : vector<1x196xi32> to vector<1x196xf32>
    %c12_i32 = arith.constant 12 : i32
    %42 = vector.broadcast %c12_i32 : i32 to vector<1x196xi32>
    %43 = arith.cmpi sle, %37, %42 : vector<1x196xi32>
    %44 = arith.extui %43 : vector<1x196xi1> to vector<1x196xi32>
    %45 = arith.sitofp %44 : vector<1x196xi32> to vector<1x196xf32>
    %c0_19 = arith.constant 0 : index
    %c0_20 = arith.constant 0 : index
    %46 = vector.load %arg8[%c0_19, %c0_20] : memref<8x226xf32, #tpu.memory_space<vmem>>, vector<8x196xf32>
    %47 = vector.broadcast %41 : vector<1x196xf32> to vector<8x196xf32>
    %48 = arith.mulf %46, %47 : vector<8x196xf32>
    %c0_21 = arith.constant 0 : index
    %c1_22 = arith.constant 1 : index
    %49 = vector.load %arg8[%c0_21, %c1_22] : memref<8x226xf32, #tpu.memory_space<vmem>>, vector<8x196xf32>
    %c0_23 = arith.constant 0 : index
    %c2 = arith.constant 2 : index
    %50 = vector.load %arg8[%c0_23, %c2] : memref<8x226xf32, #tpu.memory_space<vmem>>, vector<8x196xf32>
    %51 = vector.broadcast %45 : vector<1x196xf32> to vector<8x196xf32>
    %52 = arith.mulf %50, %51 : vector<8x196xf32>
    %c0_24 = arith.constant 0 : index
    %c14 = arith.constant 14 : index
    %53 = vector.load %arg8[%c0_24, %c14] : memref<8x226xf32, #tpu.memory_space<vmem>>, vector<8x196xf32>
    %54 = vector.broadcast %41 : vector<1x196xf32> to vector<8x196xf32>
    %55 = arith.mulf %53, %54 : vector<8x196xf32>
    %c0_25 = arith.constant 0 : index
    %c15_26 = arith.constant 15 : index
    %56 = vector.load %arg8[%c0_25, %c15_26] : memref<8x226xf32, #tpu.memory_space<vmem>>, vector<8x196xf32>
    %c0_27 = arith.constant 0 : index
    %c16 = arith.constant 16 : index
    %57 = vector.load %arg8[%c0_27, %c16] : memref<8x226xf32, #tpu.memory_space<vmem>>, vector<8x196xf32>
    %58 = vector.broadcast %45 : vector<1x196xf32> to vector<8x196xf32>
    %59 = arith.mulf %57, %58 : vector<8x196xf32>
    %c0_28 = arith.constant 0 : index
    %c28 = arith.constant 28 : index
    %60 = vector.load %arg8[%c0_28, %c28] : memref<8x226xf32, #tpu.memory_space<vmem>>, vector<8x196xf32>
    %61 = vector.broadcast %41 : vector<1x196xf32> to vector<8x196xf32>
    %62 = arith.mulf %60, %61 : vector<8x196xf32>
    %c0_29 = arith.constant 0 : index
    %c29 = arith.constant 29 : index
    %63 = vector.load %arg8[%c0_29, %c29] : memref<8x226xf32, #tpu.memory_space<vmem>>, vector<8x196xf32>
    %c0_30 = arith.constant 0 : index
    %c30 = arith.constant 30 : index
    %64 = vector.load %arg8[%c0_30, %c30] : memref<8x226xf32, #tpu.memory_space<vmem>>, vector<8x196xf32>
    %65 = vector.broadcast %45 : vector<1x196xf32> to vector<8x196xf32>
    %66 = arith.mulf %64, %65 : vector<8x196xf32>
    %67 = tpu.concatenate %48, %49, %52, %55, %56, %59, %62, %63, %66 in 0 : vector<8x196xf32>, vector<8x196xf32>, vector<8x196xf32>, vector<8x196xf32>, vector<8x196xf32>, vector<8x196xf32>, vector<8x196xf32>, vector<8x196xf32>, vector<8x196xf32> -> vector<72x196xf32>
    %c0_31 = arith.constant 0 : index
    %c0_32 = arith.constant 0 : index
    %68 = vector.load %arg5[%c0_31, %c0_32] : memref<8x72xbf16, #tpu.memory_space<vmem>>, vector<8x72xbf16>
    %69 = arith.truncf %67 : vector<72x196xf32> to vector<72x196xbf16>
    %cst_33 = arith.constant dense<0.000000e+00> : vector<8x196xf32>
    %70 = tpu.matmul %68, %69, %cst_33 {dimension_numbers = #tpu.dot_dimension_numbers<[1], [0], [0], [1], [0, 0, 1, 1], [], []>} : vector<8x72xbf16>, vector<72x196xbf16>, vector<8x196xf32> -> vector<8x196xf32>
    %c0_34 = arith.constant 0 : index
    %c1_35 = arith.constant 1 : index
    %71 = vector.load %arg4[%c0_34, %c1_35] : memref<8x2xf32, #tpu.memory_space<vmem>>, vector<8x1xf32>
    %72 = vector.broadcast %71 : vector<8x1xf32> to vector<8x196xf32>
    %73 = arith.addf %70, %72 : vector<8x196xf32>
    %cst_36 = arith.constant 0.000000e+00 : f32
    %74 = vector.broadcast %cst_36 : f32 to vector<8x196xf32>
    %75 = arith.maximumf %73, %74 : vector<8x196xf32>
    %c0_37 = arith.constant 0 : index
    %c0_38 = arith.constant 0 : index
    %76 = vector.load %arg6[%c0_37, %c0_38] : memref<32x8xbf16, #tpu.memory_space<vmem>>, vector<32x8xbf16>
    %77 = arith.truncf %75 : vector<8x196xf32> to vector<8x196xbf16>
    %cst_39 = arith.constant dense<0.000000e+00> : vector<32x196xf32>
    %78 = tpu.matmul %76, %77, %cst_39 {dimension_numbers = #tpu.dot_dimension_numbers<[1], [0], [0], [1], [0, 0, 1, 1], [], []>} : vector<32x8xbf16>, vector<8x196xbf16>, vector<32x196xf32> -> vector<32x196xf32>
    %79 = arith.addf %1, %78 : vector<32x196xf32>
    %c0_40 = arith.constant 0 : index
    %c0_41 = arith.constant 0 : index
    %c0_42 = arith.constant 0 : index
    %80 = vector.load %arg7[%c0_40, %c0_41, %c0_42] : memref<1x32x196xf32, #tpu.memory_space<vmem>>, vector<1x32x196xf32>
    %81 = vector.shape_cast %80 : vector<1x32x196xf32> to vector<32x196xf32>
    %82 = vector.shape_cast %79 : vector<32x196xf32> to vector<1x32x196xf32>
    tpu.vector_store %arg7[%c0_40, %c0_41, %c0_42], %82 {strides = array<i32>} : memref<1x32x196xf32, #tpu.memory_space<vmem>>, vector<1x32x196xf32>,
    return
  }
  func.func @transform_0(%arg0: i32) -> (i32, i32, i32) {
    %c0_i32 = arith.constant 0 : i32
    %c0_i32_0 = arith.constant 0 : i32
    %c0_i32_1 = arith.constant 0 : i32
    return %arg0, %c0_i32, %c0_i32_0 : i32, i32, i32
  }
  func.func @transform_1(%arg0: i32) -> (i32, i32) {
    %c0_i32 = arith.constant 0 : i32
    %c0_i32_0 = arith.constant 0 : i32
    %c0_i32_1 = arith.constant 0 : i32
    return %c0_i32, %c0_i32_0 : i32, i32
  }
  func.func @transform_2(%arg0: i32) -> (i32, i32) {
    %c0_i32 = arith.constant 0 : i32
    %c0_i32_0 = arith.constant 0 : i32
    %c0_i32_1 = arith.constant 0 : i32
    return %c0_i32, %c0_i32_0 : i32, i32
  }
  func.func @transform_3(%arg0: i32) -> (i32, i32) {
    %c0_i32 = arith.constant 0 : i32
    %c0_i32_0 = arith.constant 0 : i32
    %c0_i32_1 = arith.constant 0 : i32
    return %c0_i32, %c0_i32_0 : i32, i32
  }
  func.func @transform_4(%arg0: i32) -> (i32, i32) {
    %c0_i32 = arith.constant 0 : i32
    %c0_i32_0 = arith.constant 0 : i32
    %c0_i32_1 = arith.constant 0 : i32
    return %c0_i32, %c0_i32_0 : i32, i32
  }
  func.func @transform_5(%arg0: i32) -> (i32, i32) {
    %c0_i32 = arith.constant 0 : i32
    %c0_i32_0 = arith.constant 0 : i32
    %c0_i32_1 = arith.constant 0 : i32
    return %c0_i32, %c0_i32_0 : i32, i32
  }
  func.func @transform_6(%arg0: i32) -> (i32, i32, i32) {
    %c0_i32 = arith.constant 0 : i32
    %c0_i32_0 = arith.constant 0 : i32
    %c0_i32_1 = arith.constant 0 : i32
    return %arg0, %c0_i32, %c0_i32_0 : i32, i32, i32
  }
}

module attributes {stable_mosaic.version = 11 : i64} {
  func.func @_resblock_kernel(%arg0: i32, %arg1: memref<1x32x49xf32, #tpu.memory_space<vmem>>, %arg2: memref<32x2xf32, #tpu.memory_space<vmem>>, %arg3: memref<8x32xbf16, #tpu.memory_space<vmem>>, %arg4: memref<8x2xf32, #tpu.memory_space<vmem>>, %arg5: memref<8x72xbf16, #tpu.memory_space<vmem>>, %arg6: memref<32x8xbf16, #tpu.memory_space<vmem>>, %arg7: memref<1x32x49xf32, #tpu.memory_space<vmem>>, %arg8: memref<8x65xf32, #tpu.memory_space<vmem>>) attributes {dimension_semantics = [#tpu.dimension_semantics<parallel>], iteration_bounds = array<i64: 2>, scalar_prefetch = 0 : i64, scratch_operands = 1 : i64, tpu.core_type = #tpu.core_type<tc>, window_params = [{transform_indices = @transform_0, window_bounds = array<i64: 1, 32, 49>}, {pipeline_mode = #tpu.pipeline_mode<synchronous>, transform_indices = @transform_1, window_bounds = array<i64: 32, 2>}, {pipeline_mode = #tpu.pipeline_mode<synchronous>, transform_indices = @transform_2, window_bounds = array<i64: 8, 32>}, {pipeline_mode = #tpu.pipeline_mode<synchronous>, transform_indices = @transform_3, window_bounds = array<i64: 8, 2>}, {pipeline_mode = #tpu.pipeline_mode<synchronous>, transform_indices = @transform_4, window_bounds = array<i64: 8, 72>}, {pipeline_mode = #tpu.pipeline_mode<synchronous>, transform_indices = @transform_5, window_bounds = array<i64: 32, 8>}, {transform_indices = @transform_6, window_bounds = array<i64: 1, 32, 49>}]} {
    %c0 = arith.constant 0 : index
    %c0_0 = arith.constant 0 : index
    %c0_1 = arith.constant 0 : index
    %0 = vector.load %arg1[%c0, %c0_0, %c0_1] : memref<1x32x49xf32, #tpu.memory_space<vmem>>, vector<1x32x49xf32>
    %1 = vector.shape_cast %0 : vector<1x32x49xf32> to vector<32x49xf32>
    %c0_2 = arith.constant 0 : index
    %c0_3 = arith.constant 0 : index
    %2 = vector.load %arg2[%c0_2, %c0_3] : memref<32x2xf32, #tpu.memory_space<vmem>>, vector<32x1xf32>
    %3 = vector.broadcast %2 : vector<32x1xf32> to vector<32x49xf32>
    %4 = arith.mulf %1, %3 : vector<32x49xf32>
    %c0_4 = arith.constant 0 : index
    %c1 = arith.constant 1 : index
    %5 = vector.load %arg2[%c0_4, %c1] : memref<32x2xf32, #tpu.memory_space<vmem>>, vector<32x1xf32>
    %6 = vector.broadcast %5 : vector<32x1xf32> to vector<32x49xf32>
    %7 = arith.addf %4, %6 : vector<32x49xf32>
    %cst = arith.constant 0.000000e+00 : f32
    %8 = vector.broadcast %cst : f32 to vector<32x49xf32>
    %9 = arith.maximumf %7, %8 : vector<32x49xf32>
    %c0_5 = arith.constant 0 : index
    %c0_6 = arith.constant 0 : index
    %10 = vector.load %arg3[%c0_5, %c0_6] : memref<8x32xbf16, #tpu.memory_space<vmem>>, vector<8x32xbf16>
    %11 = arith.truncf %9 : vector<32x49xf32> to vector<32x49xbf16>
    %cst_7 = arith.constant dense<0.000000e+00> : vector<8x49xf32>
    %12 = tpu.matmul %10, %11, %cst_7 {dimension_numbers = #tpu.dot_dimension_numbers<[1], [0], [0], [1], [0, 0, 1, 1], [], []>} : vector<8x32xbf16>, vector<32x49xbf16>, vector<8x49xf32> -> vector<8x49xf32>
    %c0_8 = arith.constant 0 : index
    %c0_9 = arith.constant 0 : index
    %13 = vector.load %arg4[%c0_8, %c0_9] : memref<8x2xf32, #tpu.memory_space<vmem>>, vector<8x1xf32>
    %14 = vector.broadcast %13 : vector<8x1xf32> to vector<8x49xf32>
    %15 = arith.addf %12, %14 : vector<8x49xf32>
    %cst_10 = arith.constant 0.000000e+00 : f32
    %16 = vector.broadcast %cst_10 : f32 to vector<8x49xf32>
    %17 = arith.maximumf %15, %16 : vector<8x49xf32>
    %cst_11 = arith.constant 0.000000e+00 : f32
    %18 = vector.broadcast %cst_11 : f32 to vector<8x65xf32>
    %c0_12 = arith.constant 0 : index
    %c0_13 = arith.constant 0 : index
    %19 = vector.load %arg8[%c0_12, %c0_13] : memref<8x65xf32, #tpu.memory_space<vmem>>, vector<8x65xf32>
    tpu.vector_store %arg8[%c0_12, %c0_13], %18 {strides = array<i32>} : memref<8x65xf32, #tpu.memory_space<vmem>>, vector<8x65xf32>,
    %c0_14 = arith.constant 0 : index
    %c8 = arith.constant 8 : index
    %20 = vector.load %arg8[%c0_14, %c8] : memref<8x65xf32, #tpu.memory_space<vmem>>, vector<8x49xf32>
    tpu.vector_store %arg8[%c0_14, %c8], %17 {strides = array<i32>} : memref<8x65xf32, #tpu.memory_space<vmem>>, vector<8x49xf32>,
    %21 = tpu.iota {dimensions = array<i32: 1>} : vector<1x49xi32>
    %c7_i32 = arith.constant 7 : i32
    %c0_i32 = arith.constant 0 : i32
    %22 = arith.cmpi eq, %c7_i32, %c0_i32 : i32
    %c1_i32 = arith.constant 1 : i32
    %23 = arith.select %22, %c1_i32, %c7_i32 : i32
    %24 = vector.broadcast %23 : i32 to vector<1x49xi32>
    %25 = arith.remsi %21, %24 : vector<1x49xi32>
    %c0_i32_15 = arith.constant 0 : i32
    %26 = vector.broadcast %c0_i32_15 : i32 to vector<1x49xi32>
    %27 = arith.cmpi ne, %25, %26 : vector<1x49xi32>
    %c0_i32_16 = arith.constant 0 : i32
    %28 = vector.broadcast %c0_i32_16 : i32 to vector<1x49xi32>
    %29 = arith.cmpi slt, %25, %28 : vector<1x49xi32>
    %c0_i32_17 = arith.constant 0 : i32
    %30 = arith.cmpi slt, %23, %c0_i32_17 : i32
    %31 = vector.broadcast %30 : i1 to vector<1x49xi1>
    %32 = vector.broadcast %31 : vector<1x49xi1> to vector<1x49xi1>
    %33 = arith.xori %29, %32 : vector<1x49xi1>
    %34 = arith.andi %33, %27 : vector<1x49xi1>
    %35 = vector.broadcast %23 : i32 to vector<1x49xi32>
    %36 = arith.addi %25, %35 : vector<1x49xi32>
    %37 = arith.select %34, %36, %25 : vector<1x49xi1>, vector<1x49xi32>
    %c1_i32_18 = arith.constant 1 : i32
    %38 = vector.broadcast %c1_i32_18 : i32 to vector<1x49xi32>
    %39 = arith.cmpi sge, %37, %38 : vector<1x49xi32>
    %40 = arith.extui %39 : vector<1x49xi1> to vector<1x49xi32>
    %41 = arith.sitofp %40 : vector<1x49xi32> to vector<1x49xf32>
    %c5_i32 = arith.constant 5 : i32
    %42 = vector.broadcast %c5_i32 : i32 to vector<1x49xi32>
    %43 = arith.cmpi sle, %37, %42 : vector<1x49xi32>
    %44 = arith.extui %43 : vector<1x49xi1> to vector<1x49xi32>
    %45 = arith.sitofp %44 : vector<1x49xi32> to vector<1x49xf32>
    %c0_19 = arith.constant 0 : index
    %c0_20 = arith.constant 0 : index
    %46 = vector.load %arg8[%c0_19, %c0_20] : memref<8x65xf32, #tpu.memory_space<vmem>>, vector<8x49xf32>
    %47 = vector.broadcast %41 : vector<1x49xf32> to vector<8x49xf32>
    %48 = arith.mulf %46, %47 : vector<8x49xf32>
    %c0_21 = arith.constant 0 : index
    %c1_22 = arith.constant 1 : index
    %49 = vector.load %arg8[%c0_21, %c1_22] : memref<8x65xf32, #tpu.memory_space<vmem>>, vector<8x49xf32>
    %c0_23 = arith.constant 0 : index
    %c2 = arith.constant 2 : index
    %50 = vector.load %arg8[%c0_23, %c2] : memref<8x65xf32, #tpu.memory_space<vmem>>, vector<8x49xf32>
    %51 = vector.broadcast %45 : vector<1x49xf32> to vector<8x49xf32>
    %52 = arith.mulf %50, %51 : vector<8x49xf32>
    %c0_24 = arith.constant 0 : index
    %c7 = arith.constant 7 : index
    %53 = vector.load %arg8[%c0_24, %c7] : memref<8x65xf32, #tpu.memory_space<vmem>>, vector<8x49xf32>
    %54 = vector.broadcast %41 : vector<1x49xf32> to vector<8x49xf32>
    %55 = arith.mulf %53, %54 : vector<8x49xf32>
    %c0_25 = arith.constant 0 : index
    %c8_26 = arith.constant 8 : index
    %56 = vector.load %arg8[%c0_25, %c8_26] : memref<8x65xf32, #tpu.memory_space<vmem>>, vector<8x49xf32>
    %c0_27 = arith.constant 0 : index
    %c9 = arith.constant 9 : index
    %57 = vector.load %arg8[%c0_27, %c9] : memref<8x65xf32, #tpu.memory_space<vmem>>, vector<8x49xf32>
    %58 = vector.broadcast %45 : vector<1x49xf32> to vector<8x49xf32>
    %59 = arith.mulf %57, %58 : vector<8x49xf32>
    %c0_28 = arith.constant 0 : index
    %c14 = arith.constant 14 : index
    %60 = vector.load %arg8[%c0_28, %c14] : memref<8x65xf32, #tpu.memory_space<vmem>>, vector<8x49xf32>
    %61 = vector.broadcast %41 : vector<1x49xf32> to vector<8x49xf32>
    %62 = arith.mulf %60, %61 : vector<8x49xf32>
    %c0_29 = arith.constant 0 : index
    %c15 = arith.constant 15 : index
    %63 = vector.load %arg8[%c0_29, %c15] : memref<8x65xf32, #tpu.memory_space<vmem>>, vector<8x49xf32>
    %c0_30 = arith.constant 0 : index
    %c16 = arith.constant 16 : index
    %64 = vector.load %arg8[%c0_30, %c16] : memref<8x65xf32, #tpu.memory_space<vmem>>, vector<8x49xf32>
    %65 = vector.broadcast %45 : vector<1x49xf32> to vector<8x49xf32>
    %66 = arith.mulf %64, %65 : vector<8x49xf32>
    %67 = tpu.concatenate %48, %49, %52, %55, %56, %59, %62, %63, %66 in 0 : vector<8x49xf32>, vector<8x49xf32>, vector<8x49xf32>, vector<8x49xf32>, vector<8x49xf32>, vector<8x49xf32>, vector<8x49xf32>, vector<8x49xf32>, vector<8x49xf32> -> vector<72x49xf32>
    %c0_31 = arith.constant 0 : index
    %c0_32 = arith.constant 0 : index
    %68 = vector.load %arg5[%c0_31, %c0_32] : memref<8x72xbf16, #tpu.memory_space<vmem>>, vector<8x72xbf16>
    %69 = arith.truncf %67 : vector<72x49xf32> to vector<72x49xbf16>
    %cst_33 = arith.constant dense<0.000000e+00> : vector<8x49xf32>
    %70 = tpu.matmul %68, %69, %cst_33 {dimension_numbers = #tpu.dot_dimension_numbers<[1], [0], [0], [1], [0, 0, 1, 1], [], []>} : vector<8x72xbf16>, vector<72x49xbf16>, vector<8x49xf32> -> vector<8x49xf32>
    %c0_34 = arith.constant 0 : index
    %c1_35 = arith.constant 1 : index
    %71 = vector.load %arg4[%c0_34, %c1_35] : memref<8x2xf32, #tpu.memory_space<vmem>>, vector<8x1xf32>
    %72 = vector.broadcast %71 : vector<8x1xf32> to vector<8x49xf32>
    %73 = arith.addf %70, %72 : vector<8x49xf32>
    %cst_36 = arith.constant 0.000000e+00 : f32
    %74 = vector.broadcast %cst_36 : f32 to vector<8x49xf32>
    %75 = arith.maximumf %73, %74 : vector<8x49xf32>
    %c0_37 = arith.constant 0 : index
    %c0_38 = arith.constant 0 : index
    %76 = vector.load %arg6[%c0_37, %c0_38] : memref<32x8xbf16, #tpu.memory_space<vmem>>, vector<32x8xbf16>
    %77 = arith.truncf %75 : vector<8x49xf32> to vector<8x49xbf16>
    %cst_39 = arith.constant dense<0.000000e+00> : vector<32x49xf32>
    %78 = tpu.matmul %76, %77, %cst_39 {dimension_numbers = #tpu.dot_dimension_numbers<[1], [0], [0], [1], [0, 0, 1, 1], [], []>} : vector<32x8xbf16>, vector<8x49xbf16>, vector<32x49xf32> -> vector<32x49xf32>
    %79 = arith.addf %1, %78 : vector<32x49xf32>
    %c0_40 = arith.constant 0 : index
    %c0_41 = arith.constant 0 : index
    %c0_42 = arith.constant 0 : index
    %80 = vector.load %arg7[%c0_40, %c0_41, %c0_42] : memref<1x32x49xf32, #tpu.memory_space<vmem>>, vector<1x32x49xf32>
    %81 = vector.shape_cast %80 : vector<1x32x49xf32> to vector<32x49xf32>
    %82 = vector.shape_cast %79 : vector<32x49xf32> to vector<1x32x49xf32>
    tpu.vector_store %arg7[%c0_40, %c0_41, %c0_42], %82 {strides = array<i32>} : memref<1x32x49xf32, #tpu.memory_space<vmem>>, vector<1x32x49xf32>,
    return
  }
  func.func @transform_0(%arg0: i32) -> (i32, i32, i32) {
    %c0_i32 = arith.constant 0 : i32
    %c0_i32_0 = arith.constant 0 : i32
    %c0_i32_1 = arith.constant 0 : i32
    return %arg0, %c0_i32, %c0_i32_0 : i32, i32, i32
  }
  func.func @transform_1(%arg0: i32) -> (i32, i32) {
    %c0_i32 = arith.constant 0 : i32
    %c0_i32_0 = arith.constant 0 : i32
    %c0_i32_1 = arith.constant 0 : i32
    return %c0_i32, %c0_i32_0 : i32, i32
  }
  func.func @transform_2(%arg0: i32) -> (i32, i32) {
    %c0_i32 = arith.constant 0 : i32
    %c0_i32_0 = arith.constant 0 : i32
    %c0_i32_1 = arith.constant 0 : i32
    return %c0_i32, %c0_i32_0 : i32, i32
  }
  func.func @transform_3(%arg0: i32) -> (i32, i32) {
    %c0_i32 = arith.constant 0 : i32
    %c0_i32_0 = arith.constant 0 : i32
    %c0_i32_1 = arith.constant 0 : i32
    return %c0_i32, %c0_i32_0 : i32, i32
  }
  func.func @transform_4(%arg0: i32) -> (i32, i32) {
    %c0_i32 = arith.constant 0 : i32
    %c0_i32_0 = arith.constant 0 : i32
    %c0_i32_1 = arith.constant 0 : i32
    return %c0_i32, %c0_i32_0 : i32, i32
  }
  func.func @transform_5(%arg0: i32) -> (i32, i32) {
    %c0_i32 = arith.constant 0 : i32
    %c0_i32_0 = arith.constant 0 : i32
    %c0_i32_1 = arith.constant 0 : i32
    return %c0_i32, %c0_i32_0 : i32, i32
  }
  func.func @transform_6(%arg0: i32) -> (i32, i32, i32) {
    %c0_i32 = arith.constant 0 : i32
    %c0_i32_0 = arith.constant 0 : i32
    %c0_i32_1 = arith.constant 0 : i32
    return %arg0, %c0_i32, %c0_i32_0 : i32, i32, i32
  }
}

module attributes {stable_mosaic.version = 11 : i64} {
  func.func @_mask_gate_kernel(%arg0: i32, %arg1: memref<1x32x49xf32, #tpu.memory_space<vmem>>, %arg2: memref<1x32x196xf32, #tpu.memory_space<vmem>>, %arg3: memref<49x196xf32, #tpu.memory_space<vmem>>, %arg4: memref<32x2xf32, #tpu.memory_space<vmem>>, %arg5: memref<32x32xbf16, #tpu.memory_space<vmem>>, %arg6: memref<32x1xf32, #tpu.memory_space<vmem>>, %arg7: memref<32x32xbf16, #tpu.memory_space<vmem>>, %arg8: memref<1x32x196xf32, #tpu.memory_space<vmem>>) attributes {dimension_semantics = [#tpu.dimension_semantics<parallel>], iteration_bounds = array<i64: 2>, scalar_prefetch = 0 : i64, scratch_operands = 0 : i64, tpu.core_type = #tpu.core_type<tc>, window_params = [{transform_indices = @transform_0, window_bounds = array<i64: 1, 32, 49>}, {transform_indices = @transform_1, window_bounds = array<i64: 1, 32, 196>}, {pipeline_mode = #tpu.pipeline_mode<synchronous>, transform_indices = @transform_2, window_bounds = array<i64: 49, 196>}, {pipeline_mode = #tpu.pipeline_mode<synchronous>, transform_indices = @transform_3, window_bounds = array<i64: 32, 2>}, {pipeline_mode = #tpu.pipeline_mode<synchronous>, transform_indices = @transform_4, window_bounds = array<i64: 32, 32>}, {pipeline_mode = #tpu.pipeline_mode<synchronous>, transform_indices = @transform_5, window_bounds = array<i64: 32, 1>}, {pipeline_mode = #tpu.pipeline_mode<synchronous>, transform_indices = @transform_6, window_bounds = array<i64: 32, 32>}, {transform_indices = @transform_7, window_bounds = array<i64: 1, 32, 196>}]} {
    %c0 = arith.constant 0 : index
    %c0_0 = arith.constant 0 : index
    %c0_1 = arith.constant 0 : index
    %0 = vector.load %arg2[%c0, %c0_0, %c0_1] : memref<1x32x196xf32, #tpu.memory_space<vmem>>, vector<1x32x196xf32>
    %1 = vector.shape_cast %0 : vector<1x32x196xf32> to vector<32x196xf32>
    %c0_2 = arith.constant 0 : index
    %c0_3 = arith.constant 0 : index
    %c0_4 = arith.constant 0 : index
    %2 = vector.load %arg1[%c0_2, %c0_3, %c0_4] : memref<1x32x49xf32, #tpu.memory_space<vmem>>, vector<1x32x49xf32>
    %3 = vector.shape_cast %2 : vector<1x32x49xf32> to vector<32x49xf32>
    %c0_5 = arith.constant 0 : index
    %c0_6 = arith.constant 0 : index
    %4 = vector.load %arg3[%c0_5, %c0_6] : memref<49x196xf32, #tpu.memory_space<vmem>>, vector<49x196xf32>
    %cst = arith.constant dense<0.000000e+00> : vector<32x196xf32>
    %5 = tpu.matmul %3, %4, %cst {dimension_numbers = #tpu.dot_dimension_numbers<[1], [0], [0], [1], [0, 0, 1, 1], [], []>} : vector<32x49xf32>, vector<49x196xf32>, vector<32x196xf32> -> vector<32x196xf32>
    %6 = arith.addf %5, %1 : vector<32x196xf32>
    %c0_7 = arith.constant 0 : index
    %c0_8 = arith.constant 0 : index
    %7 = vector.load %arg4[%c0_7, %c0_8] : memref<32x2xf32, #tpu.memory_space<vmem>>, vector<32x1xf32>
    %8 = vector.broadcast %7 : vector<32x1xf32> to vector<32x196xf32>
    %9 = arith.mulf %6, %8 : vector<32x196xf32>
    %c0_9 = arith.constant 0 : index
    %c1 = arith.constant 1 : index
    %10 = vector.load %arg4[%c0_9, %c1] : memref<32x2xf32, #tpu.memory_space<vmem>>, vector<32x1xf32>
    %11 = vector.broadcast %10 : vector<32x1xf32> to vector<32x196xf32>
    %12 = arith.addf %9, %11 : vector<32x196xf32>
    %cst_10 = arith.constant 0.000000e+00 : f32
    %13 = vector.broadcast %cst_10 : f32 to vector<32x196xf32>
    %14 = arith.maximumf %12, %13 : vector<32x196xf32>
    %c0_11 = arith.constant 0 : index
    %c0_12 = arith.constant 0 : index
    %15 = vector.load %arg5[%c0_11, %c0_12] : memref<32x32xbf16, #tpu.memory_space<vmem>>, vector<32x32xbf16>
    %16 = arith.truncf %14 : vector<32x196xf32> to vector<32x196xbf16>
    %cst_13 = arith.constant dense<0.000000e+00> : vector<32x196xf32>
    %17 = tpu.matmul %15, %16, %cst_13 {dimension_numbers = #tpu.dot_dimension_numbers<[1], [0], [0], [1], [0, 0, 1, 1], [], []>} : vector<32x32xbf16>, vector<32x196xbf16>, vector<32x196xf32> -> vector<32x196xf32>
    %c0_14 = arith.constant 0 : index
    %c0_15 = arith.constant 0 : index
    %18 = vector.load %arg6[%c0_14, %c0_15] : memref<32x1xf32, #tpu.memory_space<vmem>>, vector<32x1xf32>
    %19 = vector.broadcast %18 : vector<32x1xf32> to vector<32x196xf32>
    %20 = arith.addf %17, %19 : vector<32x196xf32>
    %cst_16 = arith.constant 0.000000e+00 : f32
    %21 = vector.broadcast %cst_16 : f32 to vector<32x196xf32>
    %22 = arith.maximumf %20, %21 : vector<32x196xf32>
    %c0_17 = arith.constant 0 : index
    %c0_18 = arith.constant 0 : index
    %23 = vector.load %arg7[%c0_17, %c0_18] : memref<32x32xbf16, #tpu.memory_space<vmem>>, vector<32x32xbf16>
    %24 = arith.truncf %22 : vector<32x196xf32> to vector<32x196xbf16>
    %cst_19 = arith.constant dense<0.000000e+00> : vector<32x196xf32>
    %25 = tpu.matmul %23, %24, %cst_19 {dimension_numbers = #tpu.dot_dimension_numbers<[1], [0], [0], [1], [0, 0, 1, 1], [], []>} : vector<32x32xbf16>, vector<32x196xbf16>, vector<32x196xf32> -> vector<32x196xf32>
    %cst_20 = arith.constant 0.000000e+00 : f32
    %26 = vector.broadcast %cst_20 : f32 to vector<32x196xf32>
    %27 = arith.subf %26, %25 : vector<32x196xf32>
    %28 = math.exp %27 : vector<32x196xf32>
    %cst_21 = arith.constant 1.000000e+00 : f32
    %29 = vector.broadcast %cst_21 : f32 to vector<32x196xf32>
    %30 = arith.addf %29, %28 : vector<32x196xf32>
    %cst_22 = arith.constant 1.000000e+00 : f32
    %31 = vector.broadcast %cst_22 : f32 to vector<32x196xf32>
    %32 = arith.divf %31, %30 : vector<32x196xf32>
    %cst_23 = arith.constant 1.000000e+00 : f32
    %33 = vector.broadcast %cst_23 : f32 to vector<32x196xf32>
    %34 = arith.addf %33, %32 : vector<32x196xf32>
    %35 = arith.mulf %34, %1 : vector<32x196xf32>
    %c0_24 = arith.constant 0 : index
    %c0_25 = arith.constant 0 : index
    %c0_26 = arith.constant 0 : index
    %36 = vector.load %arg8[%c0_24, %c0_25, %c0_26] : memref<1x32x196xf32, #tpu.memory_space<vmem>>, vector<1x32x196xf32>
    %37 = vector.shape_cast %36 : vector<1x32x196xf32> to vector<32x196xf32>
    %38 = vector.shape_cast %35 : vector<32x196xf32> to vector<1x32x196xf32>
    tpu.vector_store %arg8[%c0_24, %c0_25, %c0_26], %38 {strides = array<i32>} : memref<1x32x196xf32, #tpu.memory_space<vmem>>, vector<1x32x196xf32>,
    return
  }
  func.func @transform_0(%arg0: i32) -> (i32, i32, i32) {
    %c0_i32 = arith.constant 0 : i32
    %c0_i32_0 = arith.constant 0 : i32
    %c0_i32_1 = arith.constant 0 : i32
    return %arg0, %c0_i32, %c0_i32_0 : i32, i32, i32
  }
  func.func @transform_1(%arg0: i32) -> (i32, i32, i32) {
    %c0_i32 = arith.constant 0 : i32
    %c0_i32_0 = arith.constant 0 : i32
    %c0_i32_1 = arith.constant 0 : i32
    return %arg0, %c0_i32, %c0_i32_0 : i32, i32, i32
  }
  func.func @transform_2(%arg0: i32) -> (i32, i32) {
    %c0_i32 = arith.constant 0 : i32
    %c0_i32_0 = arith.constant 0 : i32
    %c0_i32_1 = arith.constant 0 : i32
    return %c0_i32, %c0_i32_0 : i32, i32
  }
  func.func @transform_3(%arg0: i32) -> (i32, i32) {
    %c0_i32 = arith.constant 0 : i32
    %c0_i32_0 = arith.constant 0 : i32
    %c0_i32_1 = arith.constant 0 : i32
    return %c0_i32, %c0_i32_0 : i32, i32
  }
  func.func @transform_4(%arg0: i32) -> (i32, i32) {
    %c0_i32 = arith.constant 0 : i32
    %c0_i32_0 = arith.constant 0 : i32
    %c0_i32_1 = arith.constant 0 : i32
    return %c0_i32, %c0_i32_0 : i32, i32
  }
  func.func @transform_5(%arg0: i32) -> (i32, i32) {
    %c0_i32 = arith.constant 0 : i32
    %c0_i32_0 = arith.constant 0 : i32
    %c0_i32_1 = arith.constant 0 : i32
    return %c0_i32, %c0_i32_0 : i32, i32
  }
  func.func @transform_6(%arg0: i32) -> (i32, i32) {
    %c0_i32 = arith.constant 0 : i32
    %c0_i32_0 = arith.constant 0 : i32
    %c0_i32_1 = arith.constant 0 : i32
    return %c0_i32, %c0_i32_0 : i32, i32
  }
  func.func @transform_7(%arg0: i32) -> (i32, i32, i32) {
    %c0_i32 = arith.constant 0 : i32
    %c0_i32_0 = arith.constant 0 : i32
    %c0_i32_1 = arith.constant 0 : i32
    return %arg0, %c0_i32, %c0_i32_0 : i32, i32, i32
  }
}

</mosaic_0001>

<bundles_post_ra>
// kernel: attention_module_stage3_forward.7
= control target key start
LH: loop header
LB: loop body
LE: loop exit
PB: predicated region body
PF: predicated region fallthrough
CT: control target
= control target key end

     0   :  { %s992_s21 = smov 0   ;;  %s1123_s0 = inlined_call_operand.vmem [shape: f32[2,32,196], index: 0, kind: input, shape index: {}]   ;;  %s1124_s1 = inlined_call_operand.vmem [shape: f32[32,2], index: 1, kind: input, shape index: {}]   ;;  %s1125_s2 = inlined_call_operand.vmem [shape: bf16[8,32], index: 2, kind: input, shape index: {}]   ;;  %s1126_s3 = inlined_call_operand.vmem [shape: f32[8,2], index: 3, kind: input, shape index: {}]   ;;  %s1127_s4 = inlined_call_operand.vmem [shape: bf16[8,72], index: 4, kind: input, shape index: {}]   ;;  %s1128_s5 = inlined_call_operand.vmem [shape: bf16[32,8], index: 5, kind: input, shape index: {}]   ;;  %s1129_s6 = inlined_call_operand.vmem [shape: f32[2,32,196], index: 6, kind: output, shape index: {}]  }
   0x1 LB: > { %s802_s22 = sadd.s32 4294967295, %s938_s21   ;;  %p806_p0 = scmp.ge.s32.totalorder %s938_s21, 1  ;;  %s938_s21 = sphi %s992_s21, %s16_s21  }
   0x2   : > { %p212_p1 = scmp.lt.s32.totalorder %s938_s21, 3 }
   0x4   : > { %p213_p2 = pnand %p806_p0, %p212_p1 }
   0x5   : > { %p242_p3 = scmp.lt.s32.totalorder (!%p213_p2), %s802_s22, 1  ;;  %s943_s15 = smov (!%p213_p2), 30  }
   0x6   : > { %216 = sbr.rel (%p213_p2) target bundleno = 870 (0x366), region = 44  ;;  %s944_s16 = smov (!%p213_p2), 2  }
   0x7   : > { %s945_s17 = smov (!%p213_p2), 15   ;;  %s946_s18 = smov (!%p213_p2), 16  }
   0x8   : > { %s947_s19 = smov (!%p213_p2), 28   ;;  %s948_s20 = smov (!%p213_p2), 14  }
   0x9   : > { %s949_s23 = smov (!%p213_p2), 99   ;;  %s950_s24 = smov (!%p213_p2), 98  }
   0xa   : > { %s951_s25 = smov (!%p213_p2), 100   ;;  %s952_s26 = smov (!%p213_p2), 126  }
   0xb   : > { %v263_v0 = vld [vmem:[%s1124_s1 + $0x10] sm:$0xff]  ;;  %v940_v1 = vmov 1   ;;  %v941_v2 = vmov 0   ;;  %v261_v3 = vld [vmem:[%s1124_s1] sm:$0xff]  ;;  %v264_v4 = vld [vmem:[%s1124_s1 + $0x18] sm:$0xff]  ;;  %s1131_s22 = smov (!%p242_p3, %s802_s22), 1  ;;  %v385_v52 = vlaneseq }
   0xc   : > { %864 = vset.pattern.permute.xlu1 %v940_v1  ;;  %863 = vset.pattern.permute.xlu0 %v941_v2  ;;  %v262_v5 = vld [vmem:[%s1124_s1 + $0x8] sm:$0xff]  ;;  %v1017_v6 = vld [vmem:[%s1126_s3] sm:$0xff]  ;;  %s833_s9 = sshll.u32 %s1131_s22, 6  ;;  %vm336_vm0 = vcmask 261120   ;;  %s953_s27 = smov 113  }
   0xd   : > { %302 = vperm.xlu1 %864, %v263_v0   ;;  %277 = vperm.xlu0 %863, %v263_v0   ;;  %s246_s12 = scalar_lea.vmem %s1123_s0, %s833_s9  ;;  %v325_v51 = vld [vmem:[%s1125_s2] sm:$0xf]  ;;  %v386_v53 = vand.u32 127, %v385_v52  ;;  %s954_s28 = smov 112  }
   0xe   : > { %865 = vset.pattern.permute.xlu2 %v941_v2  ;;  %v1028_v9 = vld [vmem:[%s246_s12 + $0x20] sm:$0xff]  ;;  %v1030_v10 = vld [vmem:[%s246_s12 + $0x28] sm:$0xff]  ;;  %v1034_v14 = vld [vmem:[%s246_s12 + $0x30] sm:$0xff]  ;;  %s955_s29 = smov 114   ;;  %s956_s30 = smov 127  }
   0xf   : > { %267 = vperm.xlu2 %865, %v261_v3   ;;  %v1036_v15 = vld [vmem:[%s246_s12 + $0x38] sm:$0xff]  ;;  %v1040_v24 = vld [vmem:[%s246_s12 + $0x10] sm:$0xff]  ;;  %v1044_v26 = vld [vmem:[%s246_s12] sm:$0xff]  ;;  %v387_v54 = vadd.s32 128, %v386_v53  ;;  %v391_v55 = vand.u32 65535, %v386_v53  ;;  %v392_v57 = vshrl.u32 %v386_v53, 16 }
  0x10   : > { %v1042_v25 = vld [vmem:[%s246_s12 + $0x18] sm:$0xff]  ;;  %v1046_v27 = vld [vmem:[%s246_s12 + $0x8] sm:$0xff] }
  0x11   : > { %v423_v56 = vand.u32 65535, %v387_v54  ;;  %v395_v58 = vmul.u32 37449, %v391_v55  ;;  %v424_v59 = vshrl.u32 %v387_v54, 16  ;;  %v394_v61 = vmul.u32 9362, %v391_v55 }
  0x12   : > { %v396_v62 = vmul.u32 9362, %v392_v57 }
  0x13   : > { %v427_v60 = vmul.u32 37449, %v423_v56  ;;  %v398_v63 = vshll.u32 %v395_v58, 16  ;;  %v426_v0 = vmul.u32 9362, %v423_v56 }
  0x15   : > { %306 = vperm.xlu1 %864, %v264_v4   ;;  %282 = vperm.xlu0 %863, %v264_v4   ;;  %v397_v4 = vmul.u32 37449, %v392_v57  ;;  %vm402_vm1 = vc.u32 %v394_v61, %v398_v63 }
  0x17   : > { %272 = vperm.xlu2 %865, %v262_v5  }
  0x1d   : > { %866 = vset.pattern.permute.xlu0 %v940_v1  ;;  %298 = vperm.xlu1 %864, %v262_v5   ;;  %v428_v1 = vmul.u32 9362, %v424_v59  ;;  %v400_v5 = vshll.u32 %v396_v62, 16 }
  0x1e   : > { %294 = vperm.xlu0 %866, %v261_v3   ;;  %v430_v3 = vshll.u32 %v427_v60, 16 }
  0x1f   : > { %333 = vperm.xlu2 %865, %v1017_v6  }
  0x20   : > { %vm434_vm2 = vc.u32 %v426_v0, %v430_v3 }
  0x69   : > { %v268_v11 = vpop.permute.xlu2 %267 }
  0x6a   : > { %v285_v37 = vmul.f32 %v268_v11, %v1044_v26  ;;  %v286_v38 = vmul.f32 %v268_v11, %v1046_v27  ;;  %v429_v11 = vmul.u32 37449, %v424_v59 }
  0x71   : > { %v273_v32 = vpop.permute.xlu2 %272 }
  0x72   : > { %v287_v33 = vmul.f32 %v273_v32, %v1040_v24  ;;  %v288_v34 = vmul.f32 %v273_v32, %v1042_v25 }
  0x7f   : > { %v303_v7 = vpop.permute.xlu1 %302  ;;  %v278_v8 = vpop.permute.xlu0 %277 }
  0x80   : > { %v289_v12 = vmul.f32 %v278_v8, %v1028_v9  ;;  %v290_v13 = vmul.f32 %v278_v8, %v1030_v10  ;;  %v403_v8 = vsel %vm402_vm1, 1, %v941_v2  ;;  %vm369_vm1 = vcmask 801792  }
  0x82   : > { %v313_v20 = vadd.f32 %v303_v7, %v289_v12  ;;  %v314_v21 = vadd.f32 %v303_v7, %v290_v13  ;;  %v404_v7 = vadd.s32 %v398_v63, %v394_v61  ;;  %v432_v12 = vshll.u32 %v428_v1, 16 }
  0x83   : > { %v405_v13 = vadd.s32 %v403_v8, %v397_v4 }
  0x84   : > { %v321_v28 = vmax.f32 %v313_v20, 0.0  ;;  %v322_v30 = vmax.f32 %v314_v21, 0.0  ;;  %vm406_vm3 = vc.u32 %v404_v7, %v400_v5  ;;  %v399_v20 = vshrl.u32 %v395_v58, 16 }
  0x87   : > { %v307_v16 = vpop.permute.xlu1 %306  ;;  %v283_v17 = vpop.permute.xlu0 %282 }
  0x88   : > { %v291_v18 = vmul.f32 %v283_v17, %v1034_v14  ;;  %v292_v19 = vmul.f32 %v283_v17, %v1036_v15  ;;  %v436_v17 = vadd.s32 %v430_v3, %v426_v0 }
  0x8a   : > { %v315_v22 = vadd.f32 %v307_v16, %v291_v18  ;;  %v316_v23 = vadd.f32 %v307_v16, %v292_v19  ;;  %v435_v16 = vsel %vm434_vm2, 1, %v941_v2  ;;  %v407_v18 = vsel %vm406_vm3, 1, %v941_v2 }
  0x8b   : > { %v437_v19 = vadd.s32 %v435_v16, %v429_v11  ;;  %v409_v21 = vadd.s32 %v407_v18, %v405_v13  ;;  %vm438_vm4 = vc.u32 %v436_v17, %v432_v12  ;;  %v440_v32 = vadd.s32 %v436_v17, %v432_v12 }
  0x8c   : > { %v323_v29 = vmax.f32 %v315_v22, 0.0  ;;  %v324_v31 = vmax.f32 %v316_v23, 0.0  ;;  %v431_v22 = vshrl.u32 %v427_v60, 16  ;;  %v439_v23 = vsel %vm438_vm4, 1, %v941_v2 }
  0x8d   : > { %vm444_vm6 = vc.u32 %v440_v32, 2454267026  ;;  %vm377_vm2 = vcmask 121856   ;;  %vm381_vm3 = vcmask 1047672   ;;  %vm383_vm4 = vcmask 678912  }
  0x8e   : > { %v328_v35 = vpack.c.bf16 %v323_v29, %v321_v28  ;;  %v329_v36 = vpack.c.bf16 %v324_v31, %v322_v30  ;;  %v401_v28 = vshrl.u32 %v396_v62, 16  ;;  %v408_v29 = vadd.s32 %v404_v7, %v400_v5 }
  0x8f   : > { %v299_v39 = vpop.permute.xlu1 %298  ;;  %v410_v30 = vadd.s32 %v409_v21, %v399_v20  ;;  %v433_v31 = vshrl.u32 %v428_v1, 16 }
  0x90   : > { %v311_v40 = vadd.f32 %v299_v39, %v287_v33  ;;  %v312_v41 = vadd.f32 %v299_v39, %v288_v34  ;;  %v295_v42 = vpop.permute.xlu0 %294  ;;  %346 = vmatpush.bf16.msra.mxu2 %v328_v35  ;;  %359 = vmatpush.bf16.msra.mxu1 %v329_v36  ;;  %v441_v33 = vadd.s32 %v439_v23, %v437_v19  ;;  %vm412_vm5 = vc.u32 %v408_v29, 2454267026 }
  0x91   : > { %v309_v43 = vadd.f32 %v295_v42, %v285_v37  ;;  %v310_v44 = vadd.f32 %v295_v42, %v286_v38  ;;  %v411_v34 = vadd.s32 %v410_v30, %v401_v28  ;;  %v413_v35 = vsel %vm412_vm5, 1, %v941_v2 }
  0x92   : > { %v319_v45 = vmax.f32 %v311_v40, 0.0  ;;  %v320_v46 = vmax.f32 %v312_v41, 0.0  ;;  %v442_v36 = vadd.s32 %v441_v33, %v431_v22  ;;  %v445_v38 = vsel %vm444_vm6, 1, %v941_v2 }
  0x93   : > { %v317_v47 = vmax.f32 %v309_v43, 0.0  ;;  %v318_v48 = vmax.f32 %v310_v44, 0.0  ;;  %v414_v37 = vadd.s32 %v413_v35, %v411_v34  ;;  %vm526_vm5 = vcmask 244736  }
  0x94   : > { %v443_v39 = vadd.s32 %v442_v36, %v433_v31  ;;  %vm484_vm6 = vcmask 15360  }
  0x95   : > { %v326_v49 = vpack.c.bf16 %v319_v45, %v317_v47  ;;  %v327_v50 = vpack.c.bf16 %v320_v46, %v318_v48  ;;  %v415_v40 = vshrl.u32 %v414_v37, 3 }
  0x96   : > { %v446_v41 = vadd.s32 %v445_v38, %v443_v39 }
  0x97   : > { %347 = vmatpush.bf16.msra.mxu2 %v326_v49  ;;  %360 = vmatpush.bf16.msra.mxu1 %v327_v50  ;;  %v416_v42 = vmul.u32 14, %v415_v40  ;;  %v942_v50 = vmov 0.0  }
  0x98   : > { %v447_v43 = vshrl.u32 %v446_v41, 3  ;;  %368 = vst [vmem:[#allocation2] sm:$0xff] %v942_v50 }
  0x99   : > { %v417_v44 = vsub.s32 %v386_v53, %v416_v42  ;;  %v334_v53 = vpop.permute.xlu2 %333  ;;  %370 = vst.msk [vmem:[#allocation2 + $0x8] sm:$0xff] %vm369_vm1, %v942_v50 }
  0x9a   : > { %811 = vmatmul.msk.bf16.vlgmr.msra.gmra.mxu2 %vm336_vm0, %v325_v51  ;;  %812 = vmatmul.msk.bf16.vlgmr.msra.gmra.mxu1 %vm336_vm0, %v325_v51  ;;  %v448_v45 = vmul.u32 14, %v447_v43 }
  0x9b   : > { %vm452_vm7 = vcmp.ne.s32.totalorder %v417_v44, 0  ;;  %vm454_vm8 = vcmp.lt.s32.totalorder %v417_v44, 0  ;;  %v458_v46 = vadd.s32 14, %v417_v44 }
  0x9c   : > { %v449_v47 = vsub.s32 %v387_v54, %v448_v45  ;;  %vm456_vm9 = vmand %vm454_vm8, %vm452_vm7  ;;  %vm516_vm7 = vcmask 228352   ;;  %vm506_vm8 = vcmask 130048  }
  0x9d   : > { %v460_v48 = vsel %vm456_vm9, %v458_v46, %v417_v44  ;;  %vm496_vm9 = vcmask 113664  }
  0x9e   : > { %vm453_vm10 = vcmp.ne.s32.totalorder %v449_v47, 0  ;;  %vm455_vm11 = vcmp.lt.s32.totalorder %v449_v47, 0  ;;  %v459_v49 = vadd.s32 14, %v449_v47  ;;  %vm468_vm13 = vcmp.le.s32.totalorder %v460_v48, 12 }
  0x9f   : > { %vm457_vm12 = vmand %vm455_vm11, %vm453_vm10  ;;  %v815_v51 = vsel %vm468_vm13, 1.0, %v942_v50  ;;  %vm462_vm15 = vcmp.ge.s32.totalorder %v460_v48, 1  ;;  %vm628_vm10 = vcmask 1043456   ;;  %vm586_vm11 = vcmask 818176  }
  0xa0   : > { %v461_v2 = vsel %vm457_vm12, %v459_v49, %v449_v47  ;;  %v1061_v62 = vsel %vm462_vm15, 1.0, %v942_v50  ;;  %vm594_vm12 = vcmask 809984   ;;  %vm566_vm13 = vcmask 924672  }
  0xa1   : > { %vm469_vm14 = vcmp.le.s32.totalorder %v461_v2, 12  ;;  %vm463_vm0 = vcmp.ge.s32.totalorder %v461_v2, 1  ;;  %vm548_vm15 = vcmask 1031168  }
  0xa2   : > { %v816_v52 = vsel %vm469_vm14, 1.0, %v942_v50  ;;  %v1063_v63 = vsel %vm463_vm0, 1.0, %v942_v50  ;;  %vm576_vm14 = vcmask 916480   ;;  %vm558_vm0 = vcmask 932864  }
  0xa3   : > { %v867_v55 = vpack.i.bf16 %v816_v52, %v815_v51  ;;  %v872_v1 = vpack.i.bf16 %v1063_v63, %v1061_v62 }
  0xa5   : > { %868 = vrot.lane.b32.xlu0 %v867_v55, %s943_s15 }
  0xad   : > { %883 = vrot.lane.b32.xlu0 %v867_v55, %s944_s16  ;;  %s251_s16 = scalar_lea.vmem %s1129_s6, %s833_s9 }
 0x117   : > { %v362_v54 = vpop.f32.mrf.mxu1  ;;  %v869_v3 = vpop.permute.xlu0 %868 }
 0x118   : > { %v363_v56 = vadd.f32 %v362_v54, %v334_v53  ;;  %v871_v8 = vunpack.i.h.bf16 %v869_v3  ;;  %v870_v11 = vunpack.i.l.bf16 %v869_v3 }
 0x11a   : > { %v367_v57 = vmax.f32 %v363_v56, 0.0  ;;  %v527_v13 = vsel %vm526_vm5, %v870_v11, %v871_v8 }
 0x11c   : > { %375 = vrot.lane.b32.xlu2 %v367_v57, %s945_s17 }
 0x11d   : > { %v349_v58 = vpop.f32.mrf.mxu2 }
 0x11e   : > { %v350_v59 = vadd.f32 %v349_v58, %v334_v53 }
 0x11f   : > { %v364_v60 = vpop.f32.mrf.mxu1  ;;  %v884_v12 = vpop.permute.xlu0 %883 }
 0x120   : > { %v366_v61 = vmax.f32 %v350_v59, 0.0  ;;  %v886_v16 = vunpack.i.h.bf16 %v884_v12  ;;  %v885_v17 = vunpack.i.l.bf16 %v884_v12 }
 0x122   : > { %373 = vrot.lane.b32.xlu1 %v366_v61, %s945_s17  ;;  %v485_v32 = vsel %vm484_vm6, %v885_v17, %v886_v16 }
 0x124   : > { %878 = vrot.lane.b32.xlu2 %v867_v55, %s946_s18 }
 0x125   : > { %v351_v0 = vpop.f32.mrf.mxu2 }
 0x12a   : > { %873 = vrot.lane.b32.xlu1 %v872_v1, %s947_s19 }
 0x132   : > { %888 = vrot.lane.b32.xlu1 %v872_v1, %s948_s20 }
 0x176   : > { %v376_v4 = vpop.permute.xlu2 %375 }
 0x17e   : > { %v879_v18 = vpop.permute.xlu2 %878 }
 0x17f   : > { %v881_v28 = vunpack.i.h.bf16 %v879_v18  ;;  %v880_v33 = vunpack.i.l.bf16 %v879_v18 }
 0x181   : > { %v507_v41 = vsel %vm506_vm8, %v880_v33, %v881_v28 }
 0x194   : > { %v374_v5 = vpop.permute.xlu1 %373 }
 0x195   : > { %v378_v7 = vsel %vm377_vm2, %v374_v5, %v376_v4  ;;  %382 = vst.msk [vmem:[#allocation2] sm:$0xff] %vm381_vm3, %v374_v5  ;;  %vm624_vm2 = vcmask 588800   ;;  %vm679_vm3 = vcmask 64512  }
 0x196   : > { %384 = vst.msk [vmem:[#allocation2 + $0x8] sm:$0xff] %vm383_vm4, %v378_v7  ;;  %vm739_vm4 = vcmask 556032  }
 0x19c   : > { %v1068_v19 = vld [vmem:[#allocation2] sm:$0xff]  ;;  %v874_v20 = vpop.permute.xlu1 %873 }
 0x19d   : > { %v876_v21 = vunpack.i.h.bf16 %v874_v20  ;;  %v875_v22 = vunpack.i.l.bf16 %v874_v20  ;;  %v1070_v23 = vld [vmem:[#allocation2 + $0x8] sm:$0xff]  ;;  %v530_v30 = vmul.f32 %v870_v11, %v1068_v19  ;;  %v488_v38 = vmul.f32 %v885_v17, %v1068_v19 }
 0x19e   : > { %v892_v29 = vpack.i.bf16 %v1070_v23, %v1068_v19  ;;  %v531_v31 = vmul.f32 %v527_v13, %v1070_v23  ;;  %v489_v40 = vmul.f32 %v485_v32, %v1070_v23  ;;  %v510_v45 = vmul.f32 %v880_v33, %v1068_v19 }
 0x19f   : > { %v517_v34 = vsel %vm516_vm7, %v875_v22, %v876_v21  ;;  %v520_v35 = vmul.f32 %v875_v22, %v1068_v19  ;;  %v511_v47 = vmul.f32 %v507_v41, %v1070_v23 }
 0x1a0   : > { %893 = vrot.lane.b32.xlu1 %v892_v29, %s949_s23  ;;  %v897_v36 = vpack.i.bf16 %v531_v31, %v530_v30  ;;  %v521_v37 = vmul.f32 %v517_v34, %v1070_v23  ;;  %v917_v46 = vpack.i.bf16 %v489_v40, %v488_v38 }
 0x1a1   : > { %v912_v49 = vpack.i.bf16 %v511_v47, %v510_v45  ;;  %v607_v47 = vld [vmem:[%s1127_s4] sm:$0xf] }
 0x1a2   : > { %898 = vrot.lane.b32.xlu2 %v897_v36, %s950_s24  ;;  %v907_v39 = vpack.i.bf16 %v521_v37, %v520_v35 }
 0x1a4   : > { %v889_v42 = vpop.permute.xlu1 %888  ;;  %908 = vrot.lane.b32.xlu0 %v907_v39, %s951_s25 }
 0x1a5   : > { %v891_v43 = vunpack.i.h.bf16 %v889_v42  ;;  %v890_v44 = vunpack.i.l.bf16 %v889_v42  ;;  %v477_v42 = vmul.f32 %v1063_v63, %v1070_v23 }
 0x1a7   : > { %v497_v48 = vsel %vm496_vm9, %v890_v44, %v891_v43  ;;  %v500_v50 = vmul.f32 %v890_v44, %v1068_v19  ;;  %v476_v43 = vmul.f32 %v1061_v62, %v1068_v19 }
 0x1a8   : > { %918 = vrot.lane.b32.xlu1 %v917_v46, %s952_s26  ;;  %v501_v2 = vmul.f32 %v497_v48, %v1070_v23 }
 0x1aa   : > { %903 = vrot.lane.b32.xlu2 %v892_v29, %s953_s27  ;;  %v922_v51 = vpack.i.bf16 %v501_v2, %v500_v50 }
 0x1ac   : > { %913 = vrot.lane.b32.xlu0 %v912_v49, %s954_s28 }
 0x1b0   : > { %621 = vperm.xlu1 %864, %v1017_v6  }
 0x1b2   : > { %923 = vrot.lane.b32.xlu2 %v922_v51, %s955_s29 }
 0x1b4   : > { %928 = vrot.lane.b32.xlu0 %v892_v29, %s956_s30 }
 0x1fc   : > { %v899_v52 = vpop.permute.xlu2 %898 }
 0x1fd   : > { %v901_v55 = vunpack.i.h.bf16 %v899_v52  ;;  %v900_v53 = vunpack.i.l.bf16 %v899_v52 }
 0x1ff   : > { %v617_v54 = vpack.c.bf16 %v901_v55, %v901_v55  ;;  %v604_v56 = vsel %vm369_vm1, %v900_v53, %v901_v55  ;;  %vm538_vm1 = vcmask 1039360  }
 0x200   : > { %v616_v57 = vpack.c.bf16 %v604_v56, %v604_v56 }
 0x201   : > { %v633_v58 = vsel %vm628_vm10, %v617_v54, 0  ;;  %v835_v54 = vld [vmem:[%s1128_s5] sm:$0xff] }
 0x202   : > { %651 = vmatpush.bf16.msra.mxu3 %v633_v58  ;;  %v630_v59 = vsel %vm628_vm10, %v616_v57, 0  ;;  %v836_v57 = vld [vmem:[%s1128_s5 + $0x8] sm:$0xff] }
 0x203   : > { %638 = vmatpush.bf16.msrb.mxu2 %v630_v59 }
 0x204   : > { %v904_v60 = vpop.permute.xlu2 %903 }
 0x205   : > { %v906_v12 = vunpack.i.h.bf16 %v904_v60  ;;  %v905_v13 = vunpack.i.l.bf16 %v904_v60 }
 0x207   : > { %v567_v29 = vsel %vm566_vm13, %v905_v13, %v906_v12 }
 0x20c   : > { %v924_v17 = vpop.permute.xlu2 %923 }
 0x20d   : > { %v926_v30 = vunpack.i.h.bf16 %v924_v17  ;;  %v925_v31 = vunpack.i.l.bf16 %v924_v17 }
 0x20f   : > { %v559_v37 = vsel %vm558_vm0, %v925_v31, %v926_v30 }
 0x212   : > { %v894_v6 = vpop.permute.xlu1 %893 }
 0x213   : > { %v896_v61 = vunpack.i.h.bf16 %v894_v6  ;;  %v895_v0 = vunpack.i.l.bf16 %v894_v6 }
 0x215   : > { %v595_v8 = vsel %vm594_vm12, %v895_v0, %v896_v61 }
 0x216   : > { %v909_v1 = vpop.permute.xlu0 %908 }
 0x217   : > { %v911_v3 = vunpack.i.h.bf16 %v909_v1  ;;  %v910_v4 = vunpack.i.l.bf16 %v909_v1 }
 0x219   : > { %v615_v5 = vpack.c.bf16 %v896_v61, %v911_v3  ;;  %v587_v7 = vsel %vm586_vm11, %v910_v4, %v911_v3 }
 0x21a   : > { %v614_v11 = vpack.c.bf16 %v595_v8, %v587_v7  ;;  %v919_v16 = vpop.permute.xlu1 %918 }
 0x21b   : > { %652 = vmatpush.bf16.msra.mxu3 %v615_v5  ;;  %v921_v20 = vunpack.i.h.bf16 %v919_v16  ;;  %v920_v21 = vunpack.i.l.bf16 %v919_v16 }
 0x21c   : > { %639 = vmatpush.bf16.msrb.mxu2 %v614_v11 }
 0x21d   : > { %v549_v35 = vsel %vm548_vm15, %v920_v21, %v921_v20  ;;  %v611_v36 = vpack.c.bf16 %v926_v30, %v921_v20 }
 0x21e   : > { %v914_v18 = vpop.permute.xlu0 %913  ;;  %v610_v39 = vpack.c.bf16 %v559_v37, %v549_v35 }
 0x21f   : > { %v916_v22 = vunpack.i.h.bf16 %v914_v18  ;;  %v915_v28 = vunpack.i.l.bf16 %v914_v18 }
 0x221   : > { %v613_v32 = vpack.c.bf16 %v916_v22, %v906_v12  ;;  %v577_v33 = vsel %vm576_vm14, %v915_v28, %v916_v22 }
 0x222   : > { %v612_v34 = vpack.c.bf16 %v577_v33, %v567_v29  ;;  %v622_v48 = vpop.permute.xlu1 %621 }
 0x223   : > { %653 = vmatpush.bf16.msra.mxu3 %v613_v32 }
 0x224   : > { %640 = vmatpush.bf16.msrb.mxu2 %v612_v34 }
 0x226   : > { %v929_v38 = vpop.permute.xlu0 %928 }
 0x227   : > { %v931_v40 = vunpack.i.h.bf16 %v929_v38  ;;  %v930_v41 = vunpack.i.l.bf16 %v929_v38  ;;  %654 = vmatpush.bf16.msra.mxu3 %v611_v36 }
 0x228   : > { %641 = vmatpush.bf16.msrb.mxu2 %v610_v39 }
 0x229   : > { %v609_v44 = vpack.c.bf16 %v931_v40, %v477_v42  ;;  %v539_v45 = vsel %vm538_vm1, %v930_v41, %v931_v40 }
 0x22a   : > { %v608_v46 = vpack.c.bf16 %v539_v45, %v476_v43 }
 0x22b   : > { %655 = vmatpush.bf16.msra.mxu3 %v609_v44 }
 0x22c   : > { %642 = vmatpush.bf16.msrb.mxu2 %v608_v46 }
 0x22e   : > { %818 = vmatmul.msk.bf16.vlgmr.msra.gmra.mxu3 %vm624_vm2, %v607_v47 }
 0x22f   : > { %817 = vmatmul.msk.bf16.vlgmr.msrb.gmra.mxu2 %vm624_vm2, %v607_v47 }
 0x2b1   : > { %v657_v49 = vpop.f32.mrf.mxu3 }
 0x2b2   : > { %v658_v50 = vadd.f32 %v657_v49, %v622_v48  ;;  %v644_v63 = vpop.f32.mrf.mxu2 }
 0x2b3   : > { %v645_v23 = vadd.f32 %v644_v63, %v622_v48 }
 0x2b4   : > { %v662_v2 = vmax.f32 %v658_v50, 0.0 }
 0x2b5   : > { %v661_v51 = vmax.f32 %v645_v23, 0.0 }
 0x2b6   : > { %v668_v62 = vpack.c.bf16 %v662_v2, %v662_v2 }
 0x2b7   : > { %v667_v19 = vpack.c.bf16 %v661_v51, %v661_v51 }
 0x2b8   : > { %v690_v52 = vsel %vm628_vm10, %v668_v62, 0 }
 0x2b9   : > { %v659_v55 = vpop.f32.mrf.mxu3  ;;  %837 = vmatpush.bf16.msrb.mxu1 %v690_v52  ;;  %v687_v53 = vsel %vm628_vm10, %v667_v19, 0 }
 0x2ba   : > { %v646_v56 = vpop.f32.mrf.mxu2  ;;  %699 = vmatpush.bf16.msra.mxu0 %v687_v53 }
 0x2bc   : > { %830 = vmatmul.msk.bf16.vlgmr.msrb.gmra.mxu1 %vm679_vm3, %v836_v57 }
 0x2bd   : > { %827 = vmatmul.msk.bf16.vlgmr.msra.gmra.mxu0 %vm679_vm3, %v835_v54 }
 0x2be   : > { %718 = vmatpush.bf16.msrb.mxu0 %v690_v52 }
 0x2cd   : > { %828 = vmatmul.msk.bf16.gmra.mxu0 %vm679_vm3, %v836_v57 }
 0x2dd   : > { %829 = vmatmul.msk.bf16.vlgmr.msrb.gmra.mxu0 %vm679_vm3, %v835_v54 }
 0x339   : > { %v725_v58 = vpop.f32.mrf.mxu1 }
 0x33a   : > { %v701_v59 = vpop.f32.mrf.mxu0  ;;  %v735_v6 = vadd.f32 %v725_v58, %v1030_v10 }
 0x33b   : > { %v730_v60 = vadd.f32 %v701_v59, %v1044_v26 }
 0x33c   : > { %744 = vst.msk [vmem:[%s251_s16 + $0x28] sm:$0xff] %vm739_vm4, %v735_v6 }
 0x33d   : > { %738 = vst [vmem:[%s251_s16] sm:$0xff] %v730_v60 }
 0x341   : > { %v727_v61 = vpop.f32.mrf.mxu1 }
 0x342   : > { %v703_v0 = vpop.f32.mrf.mxu0  ;;  %v737_v1 = vadd.f32 %v727_v61, %v1036_v15 }
 0x343   : > { %v732_v3 = vadd.f32 %v703_v0, %v1040_v24 }
 0x344   : > { %746 = vst.msk [vmem:[%s251_s16 + $0x38] sm:$0xff] %vm739_vm4, %v737_v1 }
 0x345   : > { %741 = vst [vmem:[%s251_s16 + $0x10] sm:$0xff] %v732_v3 }
 0x34a   : > { %v706_v4 = vpop.f32.mrf.mxu0 }
 0x34b   : > { %v734_v5 = vadd.f32 %v706_v4, %v1028_v9 }
 0x34d   : > { %743 = vst [vmem:[%s251_s16 + $0x20] sm:$0xff] %v734_v5 }
 0x352   : > { %v708_v7 = vpop.f32.mrf.mxu0 }
 0x353   : > { %v736_v10 = vadd.f32 %v708_v7, %v1034_v14 }
 0x355   : > { %745 = vst [vmem:[%s251_s16 + $0x30] sm:$0xff] %v736_v10 }
 0x35a   : > { %v720_v26 = vpop.f32.mrf.mxu0 }
 0x35b   : > { %v731_v8 = vadd.f32 %v720_v26, %v1046_v27 }
 0x35d   : > { %740 = vst.msk [vmem:[%s251_s16 + $0x8] sm:$0xff] %vm739_vm4, %v731_v8 }
 0x362   : > { %v722_v11 = vpop.f32.mrf.mxu0 }
 0x363   : > { %v733_v15 = vadd.f32 %v722_v11, %v1042_v25 }
 0x365   : > { %742 = vst.msk [vmem:[%s251_s16 + $0x18] sm:$0xff] %vm739_vm4, %v733_v15 }
 0x366 PF: > { %s16_s21 = sadd.s32 1, %s938_s21  }
 0x367   : > { %p13_p4 = scmp.ge.s32.totalorder %s16_s21, 4  }
 0x369   :  { %15 = sbr.rel (!%p13_p4) target bundleno = 1 (0x1), region = 74 }

// kernel: attention_module_stage3_forward.12
= control target key start
LH: loop header
LB: loop body
LE: loop exit
PB: predicated region body
PF: predicated region fallthrough
CT: control target
= control target key end

     0   :  { %s1025_s24 = smov 0   ;;  %s1228_s0 = inlined_call_operand.vmem [shape: f32[2,32,49], index: 0, kind: input, shape index: {}]   ;;  %s1229_s1 = inlined_call_operand.vmem [shape: f32[2,32,196], index: 1, kind: input, shape index: {}]   ;;  %s1230_s2 = inlined_call_operand.vmem [shape: f32[49,196], index: 2, kind: input, shape index: {}]   ;;  %s1231_s3 = inlined_call_operand.vmem [shape: f32[32,2], index: 3, kind: input, shape index: {}]   ;;  %s1232_s4 = inlined_call_operand.vmem [shape: bf16[32,32], index: 4, kind: input, shape index: {}]   ;;  %s1233_s5 = inlined_call_operand.vmem [shape: f32[32,1], index: 5, kind: input, shape index: {}]   ;;  %s1234_s6 = inlined_call_operand.vmem [shape: bf16[32,32], index: 6, kind: input, shape index: {}]   ;;  %s1235_s7 = inlined_call_operand.vmem [shape: f32[2,32,196], index: 7, kind: output, shape index: {}]  }
   0x1 LB: > { %s869_s25 = sadd.s32 4294967295, %s981_s24   ;;  %p873_p0 = scmp.ge.s32.totalorder %s981_s24, 1  ;;  %s981_s24 = sphi %s1025_s24, %s17_s24  }
   0x2   : > { %p247_p1 = scmp.lt.s32.totalorder %s981_s24, 3 }
   0x4   : > { %p248_p2 = pnand %p873_p0, %p247_p1 }
   0x5   : > { %p284_p3 = scmp.lt.s32.totalorder (!%p248_p2), %s869_s25, 1 }
   0x6   : > { %251 = sbr.rel (%p248_p2) target bundleno = 543 (0x21f), region = 48 }
   0xb   : > { %v324_v0 = vld [vmem:[%s1230_s2 + $0x60] sm:$0x1]  ;;  %vm339_vm0 = vcmask 1040384   ;;  %v325_v1 = vld [vmem:[%s1230_s2 + $0x68] sm:$0x1]  ;;  %v322_v2 = vld [vmem:[%s1230_s2 + $0x50] sm:$0xff] }
   0xc   : > { %880 = vmatpush.msk.msra.mxu0 %vm339_vm0, %v324_v0  ;;  %885 = vmatpush.msk.msra.mxu1 %vm339_vm0, %v325_v1  ;;  %v323_v3 = vld [vmem:[%s1230_s2 + $0x58] sm:$0xff]  ;;  %v320_v4 = vld [vmem:[%s1230_s2 + $0x40] sm:$0xff]  ;;  %v321_v5 = vld [vmem:[%s1230_s2 + $0x48] sm:$0xff]  ;;  %v983_v6 = vmov 0   ;;  %s1237_s25 = smov (!%p284_p3, %s869_s25), 1  ;;  %v984_v10 = vmov 1  }
   0xd   : > { %937 = vset.pattern.permute.xlu0 %v983_v6  ;;  %939 = vset.pattern.permute.xlu2 %v983_v6  ;;  %v318_v7 = vld [vmem:[%s1230_s2 + $0x30] sm:$0xff]  ;;  %v319_v8 = vld [vmem:[%s1230_s2 + $0x38] sm:$0xff]  ;;  %s916_s21 = sshll.u32 %s1237_s25, 5  ;;  %v316_v11 = vld [vmem:[%s1230_s2 + $0x20] sm:$0xff]  ;;  %vm326_vm1 = vcmask 400384   ;;  %s917_s9 = sshll.u32 %s1237_s25, 6 }
   0xe   : > { %356 = vmatpush.msra.mxu0 %v322_v2  ;;  %385 = vmatpush.msra.mxu1 %v323_v3  ;;  %v406_v9 = vld [vmem:[%s1231_s3 + $0x10] sm:$0xff]  ;;  %v317_v12 = vld [vmem:[%s1230_s2 + $0x28] sm:$0xff]  ;;  %v404_v13 = vld [vmem:[%s1231_s3] sm:$0xff]  ;;  %s1081_s13 = scalar_lea.vmem %s1228_s0, %s916_s21  ;;  %s293_s12 = scalar_lea.vmem %s1229_s1, %s917_s9  ;;  %vm510_vm2 = vcmask 261120   ;;  %vm794_vm5 = vcmask 556032  }
   0xf   : > { %938 = vset.pattern.permute.xlu1 %v984_v10  ;;  %420 = vperm.xlu0 %937, %v406_v9   ;;  %v314_v14 = vld [vmem:[%s1230_s2 + $0x10] sm:$0xff]  ;;  %v315_v15 = vld [vmem:[%s1230_s2 + $0x18] sm:$0xff]  ;;  %v312_v16 = vld [vmem:[%s1230_s2] sm:$0xff]  ;;  %s1185_s23 = scalar_lea.vmem %s1235_s7, %s917_s9 }
  0x10   : > { %357 = vmatpush.msra.mxu0 %v320_v4  ;;  %386 = vmatpush.msra.mxu1 %v321_v5  ;;  %v313_v17 = vld [vmem:[%s1230_s2 + $0x8] sm:$0xff]  ;;  %v308_v18 = vld [vmem:[%s1081_s13] sm:$0xff]  ;;  %v407_v19 = vld [vmem:[%s1231_s3 + $0x18] sm:$0xff] }
  0x11   : > { %445 = vperm.xlu1 %938, %v406_v9   ;;  %410 = vperm.xlu2 %939, %v404_v13   ;;  %v405_v20 = vld [vmem:[%s1231_s3 + $0x8] sm:$0xff]  ;;  %v478_v22 = vld [vmem:[%s1233_s5 + $0x10] sm:$0xff]  ;;  %v476_v24 = vld [vmem:[%s1233_s5] sm:$0xff] }
  0x12   : > { %358 = vmatpush.msra.mxu0 %v318_v7  ;;  %387 = vmatpush.msra.mxu1 %v319_v8  ;;  %v309_v21 = vld [vmem:[%s1081_s13 + $0x8] sm:$0xff]  ;;  %v310_v23 = vld [vmem:[%s1081_s13 + $0x10] sm:$0xff]  ;;  %v311_v25 = vld [vmem:[%s1081_s13 + $0x18] sm:$0xff] }
  0x13   : > { %v477_v32 = vld [vmem:[%s1233_s5 + $0x8] sm:$0xff]  ;;  %v479_v33 = vld [vmem:[%s1233_s5 + $0x18] sm:$0xff]  ;;  %v1125_v36 = vld [vmem:[%s293_s12 + $0x20] sm:$0xff] }
  0x14   : > { %359 = vmatpush.msra.mxu0 %v316_v11  ;;  %388 = vmatpush.msra.mxu1 %v317_v12  ;;  %v1127_v38 = vld [vmem:[%s293_s12 + $0x28] sm:$0xff]  ;;  %v1129_v41 = vld [vmem:[%s293_s12 + $0x10] sm:$0xff]  ;;  %v1131_v42 = vld [vmem:[%s293_s12] sm:$0xff] }
  0x15   : > { %v1133_v43 = vld [vmem:[%s293_s12 + $0x18] sm:$0xff]  ;;  %v1137_v46 = vld [vmem:[%s293_s12 + $0x8] sm:$0xff]  ;;  %v1142_v50 = vld [vmem:[%s293_s12 + $0x30] sm:$0xff] }
  0x16   : > { %360 = vmatpush.msra.mxu0 %v314_v14  ;;  %389 = vmatpush.msra.mxu1 %v315_v15  ;;  %v1144_v51 = vld [vmem:[%s293_s12 + $0x38] sm:$0xff] }
  0x17   : > { %425 = vperm.xlu0 %937, %v407_v19  }
  0x18   : > { %361 = vmatpush.msra.mxu0 %v312_v16  ;;  %390 = vmatpush.msra.mxu1 %v313_v17 }
  0x19   : > { %881 = vmatmul.msk.f32.vlgmr.msra.gmra.mxu0 %vm326_vm1, %v308_v18  ;;  %886 = vmatmul.msk.f32.vlgmr.msra.gmra.mxu1 %vm326_vm1, %v308_v18 }
  0x1a   : > { %449 = vperm.xlu1 %938, %v407_v19   ;;  %415 = vperm.xlu2 %939, %v405_v20  }
  0x1f   : > { %940 = vset.pattern.permute.xlu0 %v984_v10 }
  0x20   : > { %437 = vperm.xlu0 %940, %v404_v13  }
  0x21   : > { %882 = vmatmul.msk.f32.gmra.mxu0 %vm326_vm1, %v309_v21  ;;  %887 = vmatmul.msk.f32.gmra.mxu1 %vm326_vm1, %v309_v21 }
  0x22   : > { %441 = vperm.xlu1 %938, %v405_v20   ;;  %492 = vperm.xlu2 %939, %v478_v22  }
  0x28   : > { %942 = vset.pattern.permute.xlu0 %v983_v6 }
  0x29   : > { %883 = vmatmul.msk.f32.gmra.mxu0 %vm326_vm1, %v310_v23  ;;  %888 = vmatmul.msk.f32.gmra.mxu1 %vm326_vm1, %v310_v23 }
  0x2a   : > { %941 = vset.pattern.permute.xlu1 %v983_v6  ;;  %482 = vperm.xlu2 %939, %v476_v24   ;;  %v919_v24 = vld [vmem:[%s1232_s4] sm:$0xff] }
  0x2b   : > { %487 = vperm.xlu0 %942, %v477_v32   ;;  %497 = vperm.xlu1 %941, %v479_v33  }
  0x31   : > { %884 = vmatmul.msk.f32.gmra.mxu0 %vm326_vm1, %v311_v25  ;;  %889 = vmatmul.msk.f32.gmra.mxu1 %vm326_vm1, %v311_v25  ;;  %v920_v25 = vld [vmem:[%s1232_s4 + $0x8] sm:$0xff] }
  0x6b   : > { %v411_v34 = vpop.permute.xlu2 %410 }
  0x74   : > { %v416_v52 = vpop.permute.xlu2 %415 }
  0x81   : > { %v421_v29 = vpop.permute.xlu0 %420 }
  0x83   : > { %v446_v28 = vpop.permute.xlu1 %445 }
  0x89   : > { %v426_v40 = vpop.permute.xlu0 %425 }
  0x8c   : > { %v450_v35 = vpop.permute.xlu1 %449 }
  0x92   : > { %v438_v0 = vpop.permute.xlu0 %437 }
  0x94   : > { %v442_v63 = vpop.permute.xlu1 %441 }
  0x96   : > { %v363_v26 = vpop.f32.mrf.mxu0  ;;  %v392_v27 = vpop.f32.mrf.mxu1 }
  0x97   : > { %v364_v48 = vadd.f32 %v363_v26, %v1131_v42  ;;  %v393_v55 = vadd.f32 %v392_v27, %v1137_v46 }
  0x99   : > { %v428_v61 = vmul.f32 %v411_v34, %v364_v48  ;;  %v429_v5 = vmul.f32 %v411_v34, %v393_v55 }
  0x9b   : > { %v452_v9 = vadd.f32 %v438_v0, %v428_v61  ;;  %v453_v15 = vadd.f32 %v438_v0, %v429_v5 }
  0x9d   : > { %v460_v20 = vmax.f32 %v452_v9, 0.0  ;;  %v461_v21 = vmax.f32 %v453_v15, 0.0  ;;  %v498_v33 = vpop.permute.xlu1 %497 }
  0x9e   : > { %v366_v30 = vpop.f32.mrf.mxu0  ;;  %v395_v31 = vpop.f32.mrf.mxu1 }
  0x9f   : > { %v367_v47 = vadd.f32 %v366_v30, %v1129_v41  ;;  %v396_v49 = vadd.f32 %v395_v31, %v1133_v43  ;;  %v488_v31 = vpop.permute.xlu0 %487 }
  0xa1   : > { %v430_v58 = vmul.f32 %v416_v52, %v367_v47  ;;  %v431_v62 = vmul.f32 %v416_v52, %v396_v49 }
  0xa3   : > { %v454_v6 = vadd.f32 %v442_v63, %v430_v58  ;;  %v455_v10 = vadd.f32 %v442_v63, %v431_v62 }
  0xa5   : > { %v462_v16 = vmax.f32 %v454_v6, 0.0  ;;  %v463_v19 = vmax.f32 %v455_v10, 0.0 }
  0xa6   : > { %v369_v37 = vpop.f32.mrf.mxu0  ;;  %v398_v39 = vpop.f32.mrf.mxu1 }
  0xa7   : > { %v370_v44 = vadd.f32 %v369_v37, %v1125_v36  ;;  %v399_v45 = vadd.f32 %v398_v39, %v1127_v38  ;;  %v472_v22 = vpack.c.bf16 %v462_v16, %v460_v20  ;;  %v473_v23 = vpack.c.bf16 %v463_v19, %v461_v21 }
  0xa9   : > { %v432_v53 = vmul.f32 %v421_v29, %v370_v44  ;;  %v433_v54 = vmul.f32 %v421_v29, %v399_v45 }
  0xab   : > { %v456_v3 = vadd.f32 %v446_v28, %v432_v53  ;;  %v457_v4 = vadd.f32 %v446_v28, %v433_v54  ;;  %v493_v28 = vpop.permute.xlu2 %492 }
  0xad   : > { %v464_v11 = vmax.f32 %v456_v3, 0.0  ;;  %v465_v13 = vmax.f32 %v457_v4, 0.0  ;;  %v922_v3 = vld [vmem:[%s1234_s6 + $0x8] sm:$0xff] }
  0xae   : > { %v372_v56 = vpop.f32.mrf.mxu0  ;;  %v401_v57 = vpop.f32.mrf.mxu1 }
  0xaf   : > { %v373_v59 = vadd.f32 %v372_v56, %v1142_v50  ;;  %v402_v60 = vadd.f32 %v401_v57, %v1144_v51 }
  0xb1   : > { %v434_v1 = vmul.f32 %v426_v40, %v373_v59  ;;  %v435_v2 = vmul.f32 %v426_v40, %v402_v60 }
  0xb3   : > { %v458_v7 = vadd.f32 %v450_v35, %v434_v1  ;;  %v459_v8 = vadd.f32 %v450_v35, %v435_v2  ;;  %v483_v47 = vpop.permute.xlu2 %482  ;;  %v921_v2 = vld [vmem:[%s1234_s6] sm:$0xff] }
  0xb5   : > { %v466_v12 = vmax.f32 %v458_v7, 0.0  ;;  %v467_v14 = vmax.f32 %v459_v8, 0.0 }
  0xb7   : > { %v474_v17 = vpack.c.bf16 %v466_v12, %v464_v11  ;;  %v475_v18 = vpack.c.bf16 %v467_v14, %v465_v13 }
  0xb9   : > { %523 = vmatpush.bf16.msrb.mxu0 %v474_v17  ;;  %923 = vmatpush.bf16.msra.mxu2 %v474_v17 }
  0xba   : > { %542 = vmatpush.bf16.msrb.mxu1 %v475_v18  ;;  %925 = vmatpush.bf16.msra.mxu3 %v475_v18 }
  0xbd   : > { %524 = vmatpush.bf16.msrb.mxu0 %v472_v22  ;;  %924 = vmatpush.bf16.msra.mxu2 %v472_v22 }
  0xbe   : > { %543 = vmatpush.bf16.msrb.mxu1 %v473_v23  ;;  %926 = vmatpush.bf16.msra.mxu3 %v473_v23 }
  0xc0   : > { %898 = vmatmul.msk.bf16.vlgmr.msrb.gmra.mxu0 %vm510_vm2, %v919_v24  ;;  %899 = vmatmul.msk.bf16.vlgmr.msra.gmra.mxu2 %vm510_vm2, %v920_v25 }
  0xc1   : > { %900 = vmatmul.msk.bf16.vlgmr.msrb.gmra.mxu1 %vm510_vm2, %v919_v24  ;;  %901 = vmatmul.msk.bf16.vlgmr.msra.gmra.mxu3 %vm510_vm2, %v920_v25 }
 0x13d   : > { %v526_v26 = vpop.f32.mrf.mxu0 }
 0x13e   : > { %v545_v27 = vpop.f32.mrf.mxu1  ;;  %v527_v52 = vadd.f32 %v526_v26, %v483_v47 }
 0x13f   : > { %v546_v55 = vadd.f32 %v545_v27, %v483_v47 }
 0x140   : > { %v555_v62 = vmax.f32 %v527_v52, 0.0 }
 0x141   : > { %v556_v63 = vmax.f32 %v546_v55, 0.0 }
 0x143   : > { %v531_v29 = vpop.f32.mrf.mxu2 }
 0x144   : > { %v550_v30 = vpop.f32.mrf.mxu3  ;;  %v532_v34 = vadd.f32 %v531_v29, %v493_v28 }
 0x145   : > { %v528_v32 = vpop.f32.mrf.mxu0  ;;  %v551_v37 = vadd.f32 %v550_v30, %v493_v28 }
 0x146   : > { %v547_v35 = vpop.f32.mrf.mxu1  ;;  %v529_v40 = vadd.f32 %v528_v32, %v488_v31  ;;  %v559_v53 = vmax.f32 %v532_v34, 0.0 }
 0x147   : > { %v548_v48 = vadd.f32 %v547_v35, %v488_v31  ;;  %v560_v56 = vmax.f32 %v551_v37, 0.0 }
 0x148   : > { %v557_v58 = vmax.f32 %v529_v40, 0.0 }
 0x149   : > { %v558_v60 = vmax.f32 %v548_v48, 0.0 }
 0x14a   : > { %v567_v0 = vpack.c.bf16 %v557_v58, %v555_v62 }
 0x14b   : > { %v533_v39 = vpop.f32.mrf.mxu2  ;;  %v568_v1 = vpack.c.bf16 %v558_v60, %v556_v63 }
 0x14c   : > { %v534_v44 = vadd.f32 %v533_v39, %v498_v33  ;;  %v552_v45 = vpop.f32.mrf.mxu3 }
 0x14d   : > { %v553_v49 = vadd.f32 %v552_v45, %v498_v33 }
 0x14e   : > { %v561_v54 = vmax.f32 %v534_v44, 0.0 }
 0x14f   : > { %v562_v57 = vmax.f32 %v553_v49, 0.0 }
 0x150   : > { %v569_v59 = vpack.c.bf16 %v561_v54, %v559_v53 }
 0x151   : > { %v570_v61 = vpack.c.bf16 %v562_v57, %v560_v56 }
 0x152   : > { %593 = vmatpush.bf16.msrb.mxu2 %v569_v59 }
 0x153   : > { %612 = vmatpush.bf16.msrb.mxu3 %v570_v61 }
 0x156   : > { %594 = vmatpush.bf16.msrb.mxu2 %v567_v0 }
 0x157   : > { %613 = vmatpush.bf16.msrb.mxu3 %v568_v1 }
 0x159   : > { %910 = vmatmul.msk.bf16.vlgmr.msrb.gmra.mxu2 %vm510_vm2, %v921_v2 }
 0x15a   : > { %912 = vmatmul.msk.bf16.vlgmr.msrb.gmra.mxu3 %vm510_vm2, %v921_v2 }
 0x169   : > { %911 = vmatmul.msk.bf16.gmra.mxu2 %vm510_vm2, %v922_v3 }
 0x16a   : > { %913 = vmatmul.msk.bf16.gmra.mxu3 %vm510_vm2, %v922_v3 }
 0x1dc   : > { %v596_v4 = vpop.f32.mrf.mxu2 }
 0x1dd   : > { %v625_v5 = vsub.f32 0.0, %v596_v4  ;;  %v615_v6 = vpop.f32.mrf.mxu3 }
 0x1de   : > { %v626_v7 = vsub.f32 0.0, %v615_v6 }
 0x1df   : > { %v633_v8 = vmul.f32 1.442695, %v625_v5 }
 0x1e0   : > { %v635_v9 = vmul.f32 1.442695, %v626_v7 }
 0x1e1   : > { %943 = vpow2.f32 %v633_v8 }
 0x1e2   : > { %945 = vpow2.f32 %v635_v9 }
 0x1e4   : > { %v598_v10 = vpop.f32.mrf.mxu2 }
 0x1e5   : > { %v627_v11 = vsub.f32 0.0, %v598_v10  ;;  %v617_v12 = vpop.f32.mrf.mxu3 }
 0x1e6   : > { %v628_v13 = vsub.f32 0.0, %v617_v12 }
 0x1e7   : > { %v944_v14 = vpop.eup %943  ;;  %v637_v15 = vmul.f32 1.442695, %v627_v11 }
 0x1e8   : > { %v946_v16 = vpop.eup %945  ;;  %v649_v17 = vadd.f32 1.0, %v944_v14  ;;  %v639_v18 = vmul.f32 1.442695, %v628_v13 }
 0x1e9   : > { %v650_v19 = vadd.f32 1.0, %v946_v16  ;;  %947 = vpow2.f32 %v637_v15 }
 0x1ea   : > { %949 = vrcp.f32 %v649_v17  ;;  %v666_v34 = vand.u32 2147483647, %v649_v17  ;;  %v668_v37 = vand.u32 2147483648, %v649_v17  ;;  %vm662_vm6 = vweird.f32 %v649_v17 }
 0x1eb   : > { %951 = vrcp.f32 %v650_v19  ;;  %v681_v40 = vand.u32 2147483647, %v650_v19  ;;  %v683_v47 = vand.u32 2147483648, %v650_v19  ;;  %vm677_vm7 = vweird.f32 %v650_v19 }
 0x1ec   : > { %953 = vpow2.f32 %v639_v18  ;;  %v601_v20 = vpop.f32.mrf.mxu2  ;;  %vm667_vm9 = vcmp.eq.f32.partialorder %v666_v34, 8.507059e+37  ;;  %v669_v55 = vor.u32 1.1754944e-38, %v668_v37 }
 0x1ed   : > { %v629_v21 = vsub.f32 0.0, %v601_v20  ;;  %v620_v22 = vpop.f32.mrf.mxu3  ;;  %vm682_vm11 = vcmp.eq.f32.partialorder %v681_v40, 8.507059e+37  ;;  %v684_v59 = vor.u32 1.1754944e-38, %v683_v47 }
 0x1ee   : > { %v630_v23 = vsub.f32 0.0, %v620_v22 }
 0x1ef   : > { %v948_v24 = vpop.eup %947  ;;  %v641_v25 = vmul.f32 1.442695, %v629_v21 }
 0x1f0   : > { %v950_v26 = vpop.eup %949  ;;  %v1169_v27 = vadd.f32 1.0, %v948_v24  ;;  %v643_v28 = vmul.f32 1.442695, %v630_v23 }
 0x1f1   : > { %v952_v29 = vpop.eup %951  ;;  %v658_v30 = vmul.f32 %v950_v26, %v649_v17  ;;  %955 = vpow2.f32 %v641_v25  ;;  %vm663_vm3 = vweird.f32 %v950_v26 }
 0x1f2   : > { %v954_v31 = vpop.eup %953  ;;  %v673_v32 = vmul.f32 %v952_v29, %v650_v19  ;;  %957 = vrcp.f32 %v1169_v27  ;;  %vm678_vm4 = vweird.f32 %v952_v29  ;;  %vm664_vm8 = vmor %vm662_vm6, %vm663_vm3  ;;  %v696_v6 = vand.u32 2147483647, %v1169_v27 }
 0x1f3   : > { %v659_v33 = vsub.f32 1.0, %v658_v30  ;;  %v1172_v35 = vadd.f32 1.0, %v954_v31  ;;  %959 = vpow2.f32 %v643_v28  ;;  %vm679_vm10 = vmor %vm677_vm7, %vm678_vm4  ;;  %v698_v8 = vand.u32 2147483648, %v1169_v27 }
 0x1f4   : > { %v674_v39 = vsub.f32 1.0, %v673_v32  ;;  %v603_v44 = vpop.f32.mrf.mxu2  ;;  %vm692_vm13 = vweird.f32 %v1169_v27  ;;  %vm697_vm0 = vcmp.eq.f32.partialorder %v696_v6, 8.507059e+37 }
 0x1f5   : > { %v660_v45 = vmul.f32 %v950_v26, %v659_v33  ;;  %961 = vrcp.f32 %v1172_v35  ;;  %v631_v53 = vsub.f32 0.0, %v603_v44  ;;  %v622_v61 = vpop.f32.mrf.mxu3  ;;  %v711_v17 = vand.u32 2147483647, %v1172_v35 }
 0x1f6   : > { %v675_v48 = vmul.f32 %v952_v29, %v674_v39  ;;  %v632_v10 = vsub.f32 0.0, %v622_v61  ;;  %v713_v18 = vand.u32 2147483648, %v1172_v35  ;;  %vm707_vm1 = vweird.f32 %v1172_v35 }
 0x1f7   : > { %v956_v49 = vpop.eup %955  ;;  %v661_v52 = vadd.f32 %v950_v26, %v660_v45  ;;  %v645_v1 = vmul.f32 1.442695, %v631_v53  ;;  %vm712_vm3 = vcmp.eq.f32.partialorder %v711_v17, 8.507059e+37 }
 0x1f8   : > { %v958_v54 = vpop.eup %957  ;;  %v676_v56 = vadd.f32 %v952_v29, %v675_v48  ;;  %v1175_v57 = vadd.f32 1.0, %v956_v49 }
 0x1f9   : > { %v665_v58 = vsel %vm664_vm8, %v950_v26, %v661_v52  ;;  %v688_v60 = vmul.f32 %v958_v54, %v1169_v27  ;;  %v960_v62 = vpop.eup %959  ;;  %vm693_vm12 = vweird.f32 %v958_v54  ;;  %v714_v26 = vor.u32 1.1754944e-38, %v713_v18 }
 0x1fa   : > { %v670_v63 = vsel %vm667_vm9, %v669_v55, %v665_v58  ;;  %v680_v0 = vsel %vm679_vm10, %v952_v29, %v676_v56  ;;  %963 = vrcp.f32 %v1175_v57  ;;  %v1190_v13 = vadd.f32 1.0, %v960_v62  ;;  %vm694_vm14 = vmor %vm692_vm13, %vm693_vm12 }
 0x1fb   : > { %v962_v2 = vpop.eup %961  ;;  %v777_v3 = vadd.f32 1.0, %v670_v63  ;;  %v685_v4 = vsel %vm682_vm11, %v684_v59, %v680_v0  ;;  %v689_v5 = vsub.f32 1.0, %v688_v60  ;;  %965 = vpow2.f32 %v645_v1 }
 0x1fc   : > { %v778_v7 = vadd.f32 1.0, %v685_v4  ;;  %v703_v9 = vmul.f32 %v962_v2, %v1172_v35  ;;  %967 = vrcp.f32 %v1190_v13  ;;  %vm708_vm15 = vweird.f32 %v962_v2 }
 0x1fd   : > { %v785_v11 = vmul.f32 %v777_v3, %v1131_v42  ;;  %v690_v12 = vmul.f32 %v958_v54, %v689_v5  ;;  %v699_v42 = vor.u32 1.1754944e-38, %v698_v8  ;;  %vm709_vm2 = vmor %vm707_vm1, %vm708_vm15  ;;  %v726_v30 = vand.u32 2147483647, %v1175_v57 }
 0x1fe   : > { %v786_v14 = vmul.f32 %v778_v7, %v1137_v46  ;;  %v704_v15 = vsub.f32 1.0, %v703_v9  ;;  %v647_v46 = vmul.f32 1.442695, %v632_v10  ;;  %v728_v31 = vand.u32 2147483648, %v1175_v57 }
 0x1ff   : > { %793 = vst [vmem:[%s1185_s23] sm:$0xff] %v785_v11  ;;  %v691_v16 = vadd.f32 %v958_v54, %v690_v12  ;;  %vm722_vm6 = vweird.f32 %v1175_v57  ;;  %vm727_vm8 = vcmp.eq.f32.partialorder %v726_v30, 8.507059e+37  ;;  %v743_v52 = vand.u32 2147483648, %v1190_v13 }
 0x200   : > { %v964_v19 = vpop.eup %963  ;;  %795 = vst.msk [vmem:[%s1185_s23 + $0x8] sm:$0xff] %vm794_vm5, %v786_v14  ;;  %v705_v20 = vmul.f32 %v962_v2, %v704_v15  ;;  %969 = vpow2.f32 %v647_v46  ;;  %v729_v48 = vor.u32 1.1754944e-38, %v728_v31  ;;  %v741_v56 = vand.u32 2147483647, %v1190_v13 }
 0x201   : > { %v695_v21 = vsel %vm694_vm14, %v958_v54, %v691_v16  ;;  %v718_v22 = vmul.f32 %v964_v19, %v1175_v57  ;;  %v966_v28 = vpop.eup %965  ;;  %vm723_vm4 = vweird.f32 %v964_v19  ;;  %vm737_vm10 = vweird.f32 %v1190_v13 }
 0x202   : > { %v700_v23 = vsel %vm697_vm0, %v699_v42, %v695_v21  ;;  %v706_v24 = vadd.f32 %v962_v2, %v705_v20  ;;  %v968_v32 = vpop.eup %967  ;;  %v655_v35 = vadd.f32 1.0, %v966_v28  ;;  %vm724_vm7 = vmor %vm722_vm6, %vm723_vm4  ;;  %v744_v60 = vor.u32 1.1754944e-38, %v743_v52 }
 0x203   : > { %v779_v25 = vadd.f32 1.0, %v700_v23  ;;  %v719_v27 = vsub.f32 1.0, %v718_v22  ;;  %v733_v40 = vmul.f32 %v968_v32, %v1190_v13  ;;  %vm738_vm9 = vweird.f32 %v968_v32 }
 0x204   : > { %v710_v29 = vsel %vm709_vm2, %v962_v2, %v706_v24  ;;  %971 = vrcp.f32 %v655_v35  ;;  %vm739_vm11 = vmor %vm737_vm10, %vm738_vm9  ;;  %vm742_vm12 = vcmp.eq.f32.partialorder %v741_v56, 8.507059e+37  ;;  %v756_v3 = vand.u32 2147483647, %v655_v35 }
 0x205   : > { %v787_v33 = vmul.f32 %v779_v25, %v1129_v41  ;;  %v715_v34 = vsel %vm712_vm3, %v714_v26, %v710_v29  ;;  %v720_v37 = vmul.f32 %v964_v19, %v719_v27  ;;  %v734_v49 = vsub.f32 1.0, %v733_v40 }
 0x206   : > { %v780_v39 = vadd.f32 1.0, %v715_v34  ;;  %v970_v45 = vpop.eup %969  ;;  %v758_v4 = vand.u32 2147483648, %v655_v35  ;;  %vm752_vm14 = vweird.f32 %v655_v35  ;;  %vm757_vm0 = vcmp.eq.f32.partialorder %v756_v3, 8.507059e+37 }
 0x207   : > { %796 = vst [vmem:[%s1185_s23 + $0x10] sm:$0xff] %v787_v33  ;;  %v721_v44 = vadd.f32 %v964_v19, %v720_v37  ;;  %v656_v53 = vadd.f32 1.0, %v970_v45  ;;  %v735_v55 = vmul.f32 %v968_v32, %v734_v49 }
 0x208   : > { %v788_v47 = vmul.f32 %v780_v39, %v1133_v43  ;;  %v759_v9 = vor.u32 1.1754944e-38, %v758_v4 }
 0x209   : > { %v725_v41 = vsel %vm724_vm7, %v964_v19, %v721_v44  ;;  %973 = vrcp.f32 %v656_v53  ;;  %v736_v43 = vadd.f32 %v968_v32, %v735_v55  ;;  %v773_v10 = vand.u32 2147483648, %v656_v53 }
 0x20a   : > { %797 = vst.msk [vmem:[%s1185_s23 + $0x18] sm:$0xff] %vm794_vm5, %v788_v47  ;;  %v730_v54 = vsel %vm727_vm8, %v729_v48, %v725_v41  ;;  %v972_v58 = vpop.eup %971  ;;  %v771_v13 = vand.u32 2147483647, %v656_v53  ;;  %vm767_vm2 = vweird.f32 %v656_v53 }
 0x20b   : > { %v781_v57 = vadd.f32 1.0, %v730_v54  ;;  %v740_v61 = vsel %vm739_vm11, %v968_v32, %v736_v43  ;;  %v748_v62 = vmul.f32 %v972_v58, %v655_v35  ;;  %vm753_vm13 = vweird.f32 %v972_v58 }
 0x20c   : > { %v745_v63 = vsel %vm742_vm12, %v744_v60, %v740_v61  ;;  %vm754_vm15 = vmor %vm752_vm14, %vm753_vm13  ;;  %v774_v16 = vor.u32 1.1754944e-38, %v773_v10  ;;  %vm772_vm4 = vcmp.eq.f32.partialorder %v771_v13, 8.507059e+37 }
 0x20d   : > { %v789_v59 = vmul.f32 %v781_v57, %v1125_v36  ;;  %v782_v0 = vadd.f32 1.0, %v745_v63  ;;  %v749_v1 = vsub.f32 1.0, %v748_v62 }
 0x20f   : > { %798 = vst [vmem:[%s1185_s23 + $0x20] sm:$0xff] %v789_v59  ;;  %v974_v2 = vpop.eup %973  ;;  %v790_v5 = vmul.f32 %v782_v0, %v1127_v38  ;;  %v750_v6 = vmul.f32 %v972_v58, %v749_v1 }
 0x210   : > { %v763_v7 = vmul.f32 %v974_v2, %v656_v53  ;;  %vm768_vm1 = vweird.f32 %v974_v2 }
 0x211   : > { %799 = vst.msk [vmem:[%s1185_s23 + $0x28] sm:$0xff] %vm794_vm5, %v790_v5  ;;  %v751_v36 = vadd.f32 %v972_v58, %v750_v6  ;;  %vm769_vm3 = vmor %vm767_vm2, %vm768_vm1 }
 0x212   : > { %v764_v8 = vsub.f32 1.0, %v763_v7 }
 0x213   : > { %v755_v11 = vsel %vm754_vm15, %v972_v58, %v751_v36 }
 0x214   : > { %v765_v12 = vmul.f32 %v974_v2, %v764_v8  ;;  %v760_v14 = vsel %vm757_vm0, %v759_v9, %v755_v11 }
 0x215   : > { %v783_v38 = vadd.f32 1.0, %v760_v14 }
 0x216   : > { %v766_v15 = vadd.f32 %v974_v2, %v765_v12 }
 0x217   : > { %v791_v17 = vmul.f32 %v783_v38, %v1142_v50 }
 0x218   : > { %v770_v18 = vsel %vm769_vm3, %v974_v2, %v766_v15 }
 0x219   : > { %v775_v19 = vsel %vm772_vm4, %v774_v16, %v770_v18  ;;  %800 = vst [vmem:[%s1185_s23 + $0x30] sm:$0xff] %v791_v17 }
 0x21a   : > { %v784_v42 = vadd.f32 1.0, %v775_v19 }
 0x21c   : > { %v792_v20 = vmul.f32 %v784_v42, %v1144_v51 }
 0x21e   : > { %801 = vst.msk [vmem:[%s1185_s23 + $0x38] sm:$0xff] %vm794_vm5, %v792_v20 }
 0x21f PF: > { %s17_s24 = sadd.s32 1, %s981_s24  }
 0x220   : > { %p14_p4 = scmp.ge.s32.totalorder %s17_s24, 4  }
 0x222   :  { %16 = sbr.rel (!%p14_p4) target bundleno = 1 (0x1), region = 81 }

// kernel: attention_module_stage3_forward.10
= control target key start
LH: loop header
LB: loop body
LE: loop exit
PB: predicated region body
PF: predicated region fallthrough
CT: control target
= control target key end

     0   :  { %s703_s21 = smov 0   ;;  %s786_s0 = inlined_call_operand.vmem [shape: f32[2,32,49], index: 0, kind: input, shape index: {}]   ;;  %s787_s1 = inlined_call_operand.vmem [shape: f32[32,2], index: 1, kind: input, shape index: {}]   ;;  %s788_s2 = inlined_call_operand.vmem [shape: bf16[8,32], index: 2, kind: input, shape index: {}]   ;;  %s789_s3 = inlined_call_operand.vmem [shape: f32[8,2], index: 3, kind: input, shape index: {}]   ;;  %s790_s4 = inlined_call_operand.vmem [shape: bf16[8,72], index: 4, kind: input, shape index: {}]   ;;  %s791_s5 = inlined_call_operand.vmem [shape: bf16[32,8], index: 5, kind: input, shape index: {}]   ;;  %s792_s6 = inlined_call_operand.vmem [shape: f32[2,32,49], index: 6, kind: output, shape index: {}]  }
   0x1 LB: > { %s585_s22 = sadd.s32 4294967295, %s649_s21   ;;  %p589_p0 = scmp.ge.s32.totalorder %s649_s21, 1  ;;  %s649_s21 = sphi %s703_s21, %s16_s21  }
   0x2   : > { %p212_p1 = scmp.lt.s32.totalorder %s649_s21, 3 }
   0x4   : > { %p213_p2 = pnand %p589_p0, %p212_p1 }
   0x5   : > { %p242_p3 = scmp.lt.s32.totalorder (!%p213_p2), %s585_s22, 1  ;;  %s654_s15 = smov (!%p213_p2), 14  }
   0x6   : > { %216 = sbr.rel (%p213_p2) target bundleno = 844 (0x34c), region = 44  ;;  %s655_s16 = smov (!%p213_p2), 16  }
   0x7   : > { %s656_s17 = smov (!%p213_p2), 7   ;;  %s657_s18 = smov (!%p213_p2), 2  }
   0x8   : > { %s658_s19 = smov (!%p213_p2), 8   ;;  %s659_s20 = smov (!%p213_p2), 9  }
   0x9   : > { %s660_s23 = smov (!%p213_p2), 113   ;;  %s661_s24 = smov (!%p213_p2), 112  }
   0xa   : > { %s662_s25 = smov (!%p213_p2), 114   ;;  %s663_s26 = smov (!%p213_p2), 126  }
   0xb   : > { %v259_v0 = vld [vmem:[%s787_s1 + $0x10] sm:$0xff]  ;;  %v651_v1 = vmov 1   ;;  %v652_v2 = vmov 0   ;;  %v257_v3 = vld [vmem:[%s787_s1] sm:$0xff]  ;;  %v260_v4 = vld [vmem:[%s787_s1 + $0x18] sm:$0xff]  ;;  %s794_s22 = smov (!%p242_p3, %s585_s22), 1  ;;  %v344_v34 = vlaneseq }
   0xc   : > { %640 = vset.pattern.permute.xlu1 %v651_v1  ;;  %639 = vset.pattern.permute.xlu0 %v652_v2  ;;  %v258_v5 = vld [vmem:[%s787_s1 + $0x8] sm:$0xff]  ;;  %v728_v6 = vld [vmem:[%s789_s3] sm:$0xff]  ;;  %s610_s9 = sshll.u32 %s794_s22, 5  ;;  %vm318_vm0 = vcmask 261120   ;;  %v653_v61 = vmov 0.0   ;;  %vm336_vm9 = vcmask 531456  }
   0xd   : > { %294 = vperm.xlu1 %640, %v259_v0   ;;  %273 = vperm.xlu0 %639, %v259_v0   ;;  %s246_s12 = scalar_lea.vmem %s786_s0, %s610_s9  ;;  %v309_v33 = vld [vmem:[%s788_s2] sm:$0xf]  ;;  %v345_v35 = vand.u32 127, %v344_v34  ;;  %337 = vst.msk [vmem:[#allocation2] sm:$0xff] %vm336_vm9, %v653_v61  ;;  %vm342_vm10 = vcmask 465984   ;;  %s664_s27 = smov 120  }
   0xe   : > { %641 = vset.pattern.permute.xlu2 %v652_v2  ;;  %v739_v9 = vld [vmem:[%s246_s12 + $0x10] sm:$0xff]  ;;  %v742_v12 = vld [vmem:[%s246_s12 + $0x18] sm:$0xff]  ;;  %v745_v18 = vld [vmem:[%s246_s12 + $0x8] sm:$0xff]  ;;  %s665_s28 = smov 119   ;;  %s666_s29 = smov 121   ;;  %vm459_vm11 = vcmask 1043456  }
   0xf   : > { %263 = vperm.xlu2 %641, %v257_v3   ;;  %v747_v19 = vld [vmem:[%s246_s12] sm:$0xff]  ;;  %v349_v36 = vand.u32 65535, %v345_v35  ;;  %v350_v37 = vshrl.u32 %v345_v35, 16  ;;  %s667_s30 = smov 127   ;;  %vm455_vm12 = vcmask 588800   ;;  %vm492_vm13 = vcmask 64512  }
  0x10   : > { %vm525_vm14 = vcmask 400384  }
  0x11   : > { %v353_v38 = vmul.u32 37449, %v349_v36  ;;  %v352_v39 = vmul.u32 9362, %v349_v36  ;;  %v354_v40 = vmul.u32 9362, %v350_v37  ;;  %v355_v44 = vmul.u32 37449, %v350_v37  ;;  %v443_v36 = vld [vmem:[%s790_s4] sm:$0xf] }
  0x13   : > { %v356_v41 = vshll.u32 %v353_v38, 16  ;;  %v358_v42 = vshll.u32 %v354_v40, 16  ;;  %v357_v48 = vshrl.u32 %v353_v38, 16  ;;  %v359_v51 = vshrl.u32 %v354_v40, 16 }
  0x15   : > { %298 = vperm.xlu1 %640, %v260_v4   ;;  %278 = vperm.xlu0 %639, %v260_v4   ;;  %vm360_vm1 = vc.u32 %v352_v39, %v356_v41  ;;  %v362_v43 = vadd.s32 %v356_v41, %v352_v39 }
  0x16   : > { %v361_v45 = vsel %vm360_vm1, 1, %v652_v2 }
  0x17   : > { %268 = vperm.xlu2 %641, %v258_v5   ;;  %vm364_vm2 = vc.u32 %v362_v43, %v358_v42  ;;  %v363_v46 = vadd.s32 %v361_v45, %v355_v44  ;;  %v366_v50 = vadd.s32 %v362_v43, %v358_v42  ;;  %v612_v43 = vld [vmem:[%s791_s5] sm:$0xff]  ;;  %v613_v45 = vld [vmem:[%s791_s5 + $0x8] sm:$0xff] }
  0x18   : > { %v365_v47 = vsel %vm364_vm2, 1, %v652_v2 }
  0x19   : > { %v367_v49 = vadd.s32 %v365_v47, %v363_v46  ;;  %vm370_vm3 = vc.u32 %v366_v50, 2454267026 }
  0x1a   : > { %v371_v54 = vsel %vm370_vm3, 1, %v652_v2 }
  0x1b   : > { %v368_v52 = vadd.s32 %v367_v49, %v357_v48 }
  0x1d   : > { %642 = vset.pattern.permute.xlu0 %v651_v1  ;;  %290 = vperm.xlu1 %640, %v258_v5   ;;  %v369_v53 = vadd.s32 %v368_v52, %v359_v51 }
  0x1e   : > { %286 = vperm.xlu0 %642, %v257_v3  }
  0x1f   : > { %315 = vperm.xlu2 %641, %v728_v6   ;;  %v372_v55 = vadd.s32 %v371_v54, %v369_v53 }
  0x21   : > { %v373_v56 = vshrl.u32 %v372_v55, 2 }
  0x23   : > { %v374_v57 = vmul.u32 7, %v373_v56 }
  0x25   : > { %v375_v58 = vsub.s32 %v345_v35, %v374_v57 }
  0x27   : > { %vm378_vm4 = vcmp.ne.s32.totalorder %v375_v58, 0  ;;  %vm379_vm5 = vcmp.lt.s32.totalorder %v375_v58, 0  ;;  %v381_v59 = vadd.s32 7, %v375_v58 }
  0x28   : > { %vm380_vm6 = vmand %vm379_vm5, %vm378_vm4 }
  0x29   : > { %v382_v60 = vsel %vm380_vm6, %v381_v59, %v375_v58 }
  0x2a   : > { %vm383_vm7 = vcmp.ge.s32.totalorder %v382_v60, 1  ;;  %vm386_vm8 = vcmp.le.s32.totalorder %v382_v60, 5 }
  0x2b   : > { %v757_v62 = vsel %vm383_vm7, 1.0, %v653_v61  ;;  %v596_v63 = vsel %vm386_vm8, 1.0, %v653_v61 }
  0x2c   : > { %405 = vrot.lane.b32.xlu0 %v757_v62, %s654_s15  ;;  %409 = vrot.lane.b32.xlu2 %v596_v63, %s655_s16  ;;  %s251_s16 = scalar_lea.vmem %s792_s6, %s610_s9 }
  0x34   : > { %397 = vrot.lane.b32.xlu0 %v757_v62, %s656_s17  ;;  %392 = vrot.lane.b32.xlu2 %v596_v63, %s657_s18 }
  0x69   : > { %v264_v10 = vpop.permute.xlu2 %263 }
  0x6a   : > { %v281_v25 = vmul.f32 %v264_v10, %v747_v19 }
  0x71   : > { %v269_v22 = vpop.permute.xlu2 %268 }
  0x72   : > { %v282_v23 = vmul.f32 %v269_v22, %v745_v18 }
  0x79   : > { %v316_v0 = vpop.permute.xlu2 %315 }
  0x7f   : > { %v295_v7 = vpop.permute.xlu1 %294  ;;  %v274_v8 = vpop.permute.xlu0 %273 }
  0x80   : > { %v283_v11 = vmul.f32 %v274_v8, %v739_v9 }
  0x82   : > { %v303_v16 = vadd.f32 %v295_v7, %v283_v11 }
  0x84   : > { %v307_v20 = vmax.f32 %v303_v16, 0.0 }
  0x86   : > { %v410_v7 = vpop.permute.xlu2 %409 }
  0x87   : > { %v299_v13 = vpop.permute.xlu1 %298  ;;  %v279_v14 = vpop.permute.xlu0 %278 }
  0x88   : > { %v284_v15 = vmul.f32 %v279_v14, %v742_v12 }
  0x8a   : > { %v304_v17 = vadd.f32 %v299_v13, %v284_v15 }
  0x8c   : > { %v308_v21 = vmax.f32 %v304_v17, 0.0 }
  0x8e   : > { %v311_v24 = vpack.c.bf16 %v308_v21, %v307_v20  ;;  %v393_v14 = vpop.permute.xlu2 %392 }
  0x8f   : > { %v291_v26 = vpop.permute.xlu1 %290 }
  0x90   : > { %v302_v27 = vadd.f32 %v291_v26, %v282_v23  ;;  %v287_v28 = vpop.permute.xlu0 %286  ;;  %328 = vmatpush.bf16.msra.mxu0 %v311_v24 }
  0x91   : > { %v301_v29 = vadd.f32 %v287_v28, %v281_v25 }
  0x92   : > { %v306_v30 = vmax.f32 %v302_v27, 0.0 }
  0x93   : > { %v305_v31 = vmax.f32 %v301_v29, 0.0 }
  0x95   : > { %v310_v32 = vpack.c.bf16 %v306_v30, %v305_v31 }
  0x97   : > { %329 = vmatpush.bf16.msra.mxu0 %v310_v32 }
  0x9a   : > { %594 = vmatmul.msk.bf16.vlgmr.msra.gmra.mxu0 %vm318_vm0, %v309_v33 }
  0x9e   : > { %v406_v10 = vpop.permute.xlu0 %405 }
  0xa6   : > { %v398_v20 = vpop.permute.xlu0 %397 }
 0x117   : > { %v331_v1 = vpop.f32.mrf.mxu0 }
 0x118   : > { %v332_v2 = vadd.f32 %v331_v1, %v316_v0 }
 0x11a   : > { %v335_v3 = vmax.f32 %v332_v2, 0.0 }
 0x11c   : > { %339 = vrot.lane.b32.xlu1 %v335_v3, %s658_s19 }
 0x11f   : > { %v333_v4 = vpop.f32.mrf.mxu0 }
 0x124   : > { %401 = vrot.lane.b32.xlu1 %v596_v63, %s659_s20 }
 0x18e   : > { %v340_v5 = vpop.permute.xlu1 %339 }
 0x18f   : > { %343 = vst.msk [vmem:[#allocation2] sm:$0xff] %vm342_vm10, %v340_v5 }
 0x196   : > { %v389_v8 = vld [vmem:[#allocation2] sm:$0xff]  ;;  %v402_v16 = vpop.permute.xlu1 %401 }
 0x197   : > { %436 = vrot.lane.b32.xlu0 %v389_v8, %s660_s23  ;;  %v412_v11 = vmul.f32 %v410_v7, %v389_v8  ;;  %v408_v13 = vmul.f32 %v406_v10, %v389_v8  ;;  %v395_v15 = vmul.f32 %v393_v14, %v389_v8  ;;  %v404_v17 = vmul.f32 %v402_v16, %v389_v8 }
 0x198   : > { %v400_v21 = vmul.f32 %v398_v20, %v389_v8  ;;  %v390_v34 = vmul.f32 %v757_v62, %v389_v8 }
 0x199   : > { %440 = vrot.lane.b32.xlu1 %v412_v11, %s661_s24  ;;  %433 = vrot.lane.b32.xlu2 %v408_v13, %s662_s25 }
 0x19f   : > { %418 = vrot.lane.b32.xlu0 %v395_v15, %s663_s26 }
 0x1a1   : > { %425 = vrot.lane.b32.xlu1 %v389_v8, %s664_s27  ;;  %429 = vrot.lane.b32.xlu2 %v404_v17, %s665_s28 }
 0x1a7   : > { %452 = vperm.xlu0 %642, %v728_v6  }
 0x1a9   : > { %422 = vrot.lane.b32.xlu1 %v400_v21, %s666_s29  ;;  %414 = vrot.lane.b32.xlu2 %v389_v8, %s667_s30 }
 0x1f3   : > { %v434_v22 = vpop.permute.xlu2 %433 }
 0x1fb   : > { %v430_v28 = vpop.permute.xlu2 %429 }
 0x203   : > { %v415_v33 = vpop.permute.xlu2 %414 }
 0x204   : > { %v444_v35 = vpack.c.bf16 %v415_v33, %v390_v34 }
 0x209   : > { %v437_v25 = vpop.permute.xlu0 %436 }
 0x20a   : > { %v447_v27 = vpack.c.bf16 %v437_v25, %v434_v22 }
 0x20b   : > { %v441_v23 = vpop.permute.xlu1 %440 }
 0x20c   : > { %v448_v24 = vpack.c.bf16 %v441_v23, %v441_v23 }
 0x20e   : > { %v461_v26 = vsel %vm459_vm11, %v448_v24, 0 }
 0x20f   : > { %466 = vmatpush.bf16.msra.mxu1 %v461_v26 }
 0x211   : > { %v419_v31 = vpop.permute.xlu0 %418 }
 0x213   : > { %467 = vmatpush.bf16.msra.mxu1 %v447_v27  ;;  %v426_v29 = vpop.permute.xlu1 %425 }
 0x214   : > { %v446_v30 = vpack.c.bf16 %v430_v28, %v426_v29 }
 0x217   : > { %468 = vmatpush.bf16.msra.mxu1 %v446_v30 }
 0x219   : > { %v453_v37 = vpop.permute.xlu0 %452 }
 0x21b   : > { %v423_v6 = vpop.permute.xlu1 %422 }
 0x21c   : > { %v445_v32 = vpack.c.bf16 %v423_v6, %v419_v31 }
 0x21e   : > { %469 = vmatpush.bf16.msra.mxu1 %v445_v32 }
 0x222   : > { %470 = vmatpush.bf16.msra.mxu1 %v444_v35 }
 0x225   : > { %597 = vmatmul.msk.bf16.vlgmr.msra.gmra.mxu1 %vm455_vm12, %v443_v36 }
 0x2a2   : > { %v472_v38 = vpop.f32.mrf.mxu1 }
 0x2a3   : > { %v473_v39 = vadd.f32 %v472_v38, %v453_v37 }
 0x2a5   : > { %v476_v40 = vmax.f32 %v473_v39, 0.0 }
 0x2a7   : > { %v481_v41 = vpack.c.bf16 %v476_v40, %v476_v40 }
 0x2a9   : > { %v500_v42 = vsel %vm459_vm11, %v481_v41, 0 }
 0x2aa   : > { %v474_v44 = vpop.f32.mrf.mxu1  ;;  %509 = vmatpush.bf16.msra.mxu2 %v500_v42 }
 0x2ad   : > { %606 = vmatmul.msk.bf16.vlgmr.msra.gmra.mxu2 %vm492_vm13, %v612_v43 }
 0x2bd   : > { %607 = vmatmul.msk.bf16.gmra.mxu2 %vm492_vm13, %v613_v45 }
 0x330   : > { %v511_v46 = vpop.f32.mrf.mxu2 }
 0x331   : > { %v521_v47 = vadd.f32 %v511_v46, %v747_v19 }
 0x333   : > { %526 = vst.msk [vmem:[%s251_s16] sm:$0xff] %vm525_vm14, %v521_v47 }
 0x338   : > { %v513_v48 = vpop.f32.mrf.mxu2 }
 0x339   : > { %v522_v49 = vadd.f32 %v513_v48, %v745_v18 }
 0x33b   : > { %527 = vst.msk [vmem:[%s251_s16 + $0x8] sm:$0xff] %vm525_vm14, %v522_v49 }
 0x340   : > { %v516_v50 = vpop.f32.mrf.mxu2 }
 0x341   : > { %v523_v51 = vadd.f32 %v516_v50, %v739_v9 }
 0x343   : > { %528 = vst.msk [vmem:[%s251_s16 + $0x10] sm:$0xff] %vm525_vm14, %v523_v51 }
 0x348   : > { %v518_v52 = vpop.f32.mrf.mxu2 }
 0x349   : > { %v524_v53 = vadd.f32 %v518_v52, %v742_v12 }
 0x34b   : > { %529 = vst.msk [vmem:[%s251_s16 + $0x18] sm:$0xff] %vm525_vm14, %v524_v53 }
 0x34c PF: > { %s16_s21 = sadd.s32 1, %s649_s21  }
 0x34d   : > { %p13_p4 = scmp.ge.s32.totalorder %s16_s21, 4  }
 0x34f   :  { %15 = sbr.rel (!%p13_p4) target bundleno = 1 (0x1), region = 74 }

</bundles_post_ra>
